<compile_context>
chip_gen: v6e
topology: v6e:2x2x1
jax: 0.10.0
libtpu: 0.0.40
codegen_flags: <defaults>
</compile_context>

<pallas_src>
import jax
import jax.numpy as jnp
from jax.experimental import pallas as pl
from jax.experimental.pallas import tpu as pltpu


# ---------------------------------------------------------------------------
# Fused kernel: conv1 + ReLU -> conv2 + ReLU -> flatten -> fc + ReLU
# One grid step == one image.  All intermediates stay in VMEM.
# ---------------------------------------------------------------------------
def _percept_kernel(p1_ref, w1_ref, b1_ref, w2_ref, b2_ref, wf_ref, bf_ref,
                    out_ref, p2_ref, f_ref):
    # conv1, flipped GEMM: (16,192) @ (192,1296) -> (16,1296), lane-dense.
    a1 = jnp.dot(w1_ref[...], p1_ref[0],
                 preferred_element_type=jnp.float32)
    a1 = jnp.maximum(a1 + b1_ref[...], 0.0).astype(jnp.bfloat16)

    # Scatter the 16 conv2 taps (columns k2*81 .. k2*81+80 of a1) into the
    # conv2 patch matrix (256, 81): rows k2*16 + cin, cols = conv2 position.
    for k2 in range(16):
        p2_ref[k2 * 16:(k2 + 1) * 16, :] = a1[:, k2 * 81:(k2 + 1) * 81]

    # conv2, flipped GEMM: (32,256) @ (256,81) -> (32,81).
    a2 = jnp.dot(w2_ref[...], p2_ref[...],
                 preferred_element_type=jnp.float32)
    a2 = jnp.maximum(a2 + b2_ref[...], 0.0)

    # Flatten in torch's x.view(B,-1) order (channel-major: c*81 + h*9 + w)
    # into a single lane vector via 32 contiguous lane-slice stores.
    for c in range(32):
        f_ref[:, c * 81:(c + 1) * 81] = a2[c:c + 1, :]

    # fc: (1,2592) @ (2592, num_actions*16) -> (1, num_actions*16).
    o = jnp.dot(f_ref[...].astype(jnp.bfloat16), wf_ref[...],
                preferred_element_type=jnp.float32)
    out_ref[0] = jnp.maximum(o + bf_ref[...], 0.0).astype(out_ref.dtype)


# ---------------------------------------------------------------------------
# Wrapper-side patch construction (pure JAX, fused by XLA).
# ---------------------------------------------------------------------------
def _conv1_patches_grouped(x_nchw):
    """conv1 im2col patches grouped by the conv2 tap that consumes them.

    Returns (B, 192, 1296) bf16.  Column index = k2*81 + (oh2*9 + ow2) where
    k2 = kh2*4 + kw2 is the conv2 kernel tap and (oh2, ow2) the conv2 output
    position.  Row index = kh1*24 + kw1*3 + ci (conv1 patch order, matching
    the prepared conv1 weight).
    """
    B = x_nchw.shape[0]
    x = jnp.transpose(x_nchw, (0, 2, 3, 1))                       # (B,84,84,3)

    # Standard conv1 im2col at all 20x20 conv1 output positions.
    cols = []
    for kh in range(8):
        for kw in range(8):
            cols.append(x[:, kh:kh + 77:4, kw:kw + 77:4, :])      # (B,20,20,3)
    p = jnp.stack(cols, axis=3).reshape(B, 20, 20, 192)           # (kh,kw,ci)

    # Group conv1 positions by the conv2 tap (kh2, kw2) that reads them:
    # conv2 output (oh2, ow2), tap (kh2, kw2) reads conv1 position
    # (2*oh2 + kh2, 2*ow2 + kw2).
    blocks = []
    for kh2 in range(4):
        for kw2 in range(4):
            blocks.append(p[:, kh2:kh2 + 17:2, kw2:kw2 + 17:2, :])  # (B,9,9,192)
    q = jnp.stack(blocks, axis=1).reshape(B, 16 * 81, 192)        # row=k2*81+s2
    return jnp.transpose(q, (0, 2, 1)).astype(jnp.bfloat16)       # (B,192,1296)


# ---------------------------------------------------------------------------
# Parameter init (torch layout) and one-time layout preparation.
# ---------------------------------------------------------------------------
def init_params(key, num_actions):
    ks = jax.random.split(key, 6)

    def u(k, shape, fan_in):
        bound = 1.0 / jnp.sqrt(jnp.float32(fan_in))
        return jax.random.uniform(k, shape, jnp.float32, -bound, bound)

    return {
        "conv1_w": u(ks[0], (16, 3, 8, 8), 3 * 8 * 8),
        "conv1_b": u(ks[1], (16,), 3 * 8 * 8),
        "conv2_w": u(ks[2], (32, 16, 4, 4), 16 * 4 * 4),
        "conv2_b": u(ks[3], (32,), 16 * 4 * 4),
        "fc_w": u(ks[4], (num_actions * 16, 32 * 9 * 9), 32 * 9 * 9),
        "fc_b": u(ks[5], (num_actions * 16,), 32 * 9 * 9),
    }


def prepare_params(params):
    """One-time weight re-layout (done outside the per-step forward)."""
    bf16, f32 = jnp.bfloat16, jnp.float32
    # conv weights -> (Cout, KH*KW*Cin) with column order (kh, kw, ci).
    w1t = jnp.transpose(params["conv1_w"], (0, 2, 3, 1)).reshape(16, 192)
    w2t = jnp.transpose(params["conv2_w"], (0, 2, 3, 1)).reshape(32, 256)
    return {
        "w1t": w1t.astype(bf16),
        "b1": params["conv1_b"].reshape(16, 1).astype(f32),
        "w2t": w2t.astype(bf16),
        "b2": params["conv2_b"].reshape(32, 1).astype(f32),
        # torch fc input index is c*81 + h*9 + w, exactly the order the kernel
        # produces, so a plain transpose is all that's needed.
        "wfm": params["fc_w"].T.astype(bf16),          # (2592, num_actions*16)
        "bf": params["fc_b"].reshape(1, -1).astype(f32),
    }


# ---------------------------------------------------------------------------
# Percept forward (fused Pallas call)
# ---------------------------------------------------------------------------
def percept_forward(prep, x_nchw):
    assert x_nchw.shape[1:] == (3, 84, 84), x_nchw.shape
    B = x_nchw.shape[0]
    n_out = prep["wfm"].shape[1]

    p1t = _conv1_patches_grouped(x_nchw)               # (B, 192, 1296) bf16

    out = pl.pallas_call(
        _percept_kernel,
        out_shape=jax.ShapeDtypeStruct((B, 1, n_out), jnp.float32),
        grid_spec=pltpu.PrefetchScalarGridSpec(
            num_scalar_prefetch=0,
            grid=(B,),
            in_specs=[
                pl.BlockSpec((1, 192, 1296), lambda b: (b, 0, 0)),  # patches
                pl.BlockSpec((16, 192), lambda b: (0, 0)),          # conv1 w
                pl.BlockSpec((16, 1), lambda b: (0, 0)),            # conv1 b
                pl.BlockSpec((32, 256), lambda b: (0, 0)),          # conv2 w
                pl.BlockSpec((32, 1), lambda b: (0, 0)),            # conv2 b
                pl.BlockSpec((2592, n_out), lambda b: (0, 0)),      # fc w
                pl.BlockSpec((1, n_out), lambda b: (0, 0)),         # fc b
            ],
            out_specs=pl.BlockSpec((1, 1, n_out), lambda b: (b, 0, 0)),
            scratch_shapes=[
                pltpu.VMEM((256, 81), jnp.bfloat16),   # conv2 patch matrix
                pltpu.VMEM((1, 2592), jnp.float32),    # flattened features
            ],
        ),
        compiler_params=pltpu.CompilerParams(
            dimension_semantics=("parallel",),         # batch across cores
            vmem_limit_bytes=32 * 1024 * 1024,
        ),
    )(p1t, prep["w1t"], prep["b1"], prep["w2t"], prep["b2"],
      prep["wfm"], prep["bf"])
    return out.reshape(B, n_out)


# Pure-JAX f32 reference for correctness checking (torch semantics).
def percept_reference(params, x_nchw):
    dn1 = jax.lax.conv_dimension_numbers(
        x_nchw.shape, params["conv1_w"].shape, ("NCHW", "OIHW", "NCHW"))
    x = jax.lax.conv_general_dilated(
        x_nchw, params["conv1_w"], (4, 4), "VALID", dimension_numbers=dn1)
    x = jax.nn.relu(x + params["conv1_b"][None, :, None, None])
    dn2 = jax.lax.conv_dimension_numbers(
        x.shape, params["conv2_w"].shape, ("NCHW", "OIHW", "NCHW"))
    x = jax.lax.conv_general_dilated(
        x, params["conv2_w"], (2, 2), "VALID", dimension_numbers=dn2)
    x = jax.nn.relu(x + params["conv2_b"][None, :, None, None])
    x = x.reshape(x.shape[0], -1)
    return jax.nn.relu(x @ params["fc_w"].T + params["fc_b"])


if __name__ == "__main__":
    key = jax.random.PRNGKey(0)
    k_param, k_x = jax.random.split(key)

    num_actions = 4
    batch = 2
    params = init_params(k_param, num_actions)
    prep = prepare_params(params)
    # Input spatial size is fixed at 84x84 by the fc layer (32*9*9).
    x = jax.random.uniform(k_x, (batch, 3, 84, 84), jnp.float32)

    fwd = jax.jit(percept_forward)
    out = jax.block_until_ready(fwd(prep, x))
    assert out.shape == (batch, num_actions * 16), out.shape

    ref = jax.block_until_ready(percept_reference(params, x))
    # bf16 matmul inputs (f32 accumulation) per the perf review -> slightly
    # looser tolerance than pure f32; still far below any layout-bug error.
    err = float(jnp.max(jnp.abs(out - ref)))
    assert jnp.allclose(out, ref, rtol=2e-2, atol=2e-2), err

    print("KERNEL_OK")
</pallas_src>

<mosaic_0001>
module attributes {stable_mosaic.version = 11 : i64} {
  func.func @_percept_kernel(%arg0: i32, %arg1: memref<1x192x1296xbf16, #tpu.memory_space<vmem>>, %arg2: memref<16x192xbf16, #tpu.memory_space<vmem>>, %arg3: memref<16x1xf32, #tpu.memory_space<vmem>>, %arg4: memref<32x256xbf16, #tpu.memory_space<vmem>>, %arg5: memref<32x1xf32, #tpu.memory_space<vmem>>, %arg6: memref<2592x64xbf16, #tpu.memory_space<vmem>>, %arg7: memref<1x64xf32, #tpu.memory_space<vmem>>, %arg8: memref<1x1x64xf32, #tpu.memory_space<vmem>>, %arg9: memref<256x81xbf16, #tpu.memory_space<vmem>>, %arg10: memref<1x2592xf32, #tpu.memory_space<vmem>>) attributes {dimension_semantics = [#tpu.dimension_semantics<parallel>], iteration_bounds = array<i64: 2>, scalar_prefetch = 0 : i64, scratch_operands = 2 : i64, tpu.core_type = #tpu.core_type<tc>, window_params = [{transform_indices = @transform_0, window_bounds = array<i64: 1, 192, 1296>}, {pipeline_mode = #tpu.pipeline_mode<synchronous>, transform_indices = @transform_1, window_bounds = array<i64: 16, 192>}, {pipeline_mode = #tpu.pipeline_mode<synchronous>, transform_indices = @transform_2, window_bounds = array<i64: 16, 1>}, {pipeline_mode = #tpu.pipeline_mode<synchronous>, transform_indices = @transform_3, window_bounds = array<i64: 32, 256>}, {pipeline_mode = #tpu.pipeline_mode<synchronous>, transform_indices = @transform_4, window_bounds = array<i64: 32, 1>}, {pipeline_mode = #tpu.pipeline_mode<synchronous>, transform_indices = @transform_5, window_bounds = array<i64: 2592, 64>}, {pipeline_mode = #tpu.pipeline_mode<synchronous>, transform_indices = @transform_6, window_bounds = array<i64: 1, 64>}, {transform_indices = @transform_7, window_bounds = array<i64: 1, 1, 64>}]} {
    %c0 = arith.constant 0 : index
    %c0_0 = arith.constant 0 : index
    %0 = vector.load %arg2[%c0, %c0_0] : memref<16x192xbf16, #tpu.memory_space<vmem>>, vector<16x192xbf16>
    %c0_1 = arith.constant 0 : index
    %c0_2 = arith.constant 0 : index
    %c0_3 = arith.constant 0 : index
    %1 = vector.load %arg1[%c0_1, %c0_2, %c0_3] : memref<1x192x1296xbf16, #tpu.memory_space<vmem>>, vector<1x192x1296xbf16>
    %2 = vector.shape_cast %1 : vector<1x192x1296xbf16> to vector<192x1296xbf16>
    %cst = arith.constant dense<0.000000e+00> : vector<16x1296xf32>
    %3 = tpu.matmul %0, %2, %cst {dimension_numbers = #tpu.dot_dimension_numbers<[1], [0], [0], [1], [0, 0, 1, 1], [], []>} : vector<16x192xbf16>, vector<192x1296xbf16>, vector<16x1296xf32> -> vector<16x1296xf32>
    %c0_4 = arith.constant 0 : index
    %c0_5 = arith.constant 0 : index
    %4 = vector.load %arg3[%c0_4, %c0_5] : memref<16x1xf32, #tpu.memory_space<vmem>>, vector<16x1xf32>
    %5 = vector.broadcast %4 : vector<16x1xf32> to vector<16x1296xf32>
    %6 = arith.addf %3, %5 : vector<16x1296xf32>
    %cst_6 = arith.constant 0.000000e+00 : f32
    %7 = vector.broadcast %cst_6 : f32 to vector<16x1296xf32>
    %8 = arith.maximumf %6, %7 : vector<16x1296xf32>
    %9 = arith.truncf %8 : vector<16x1296xf32> to vector<16x1296xbf16>
    %10 = vector.extract_strided_slice %9 {offsets = [0, 0], sizes = [16, 81], strides = [1, 1]} : vector<16x1296xbf16> to vector<16x81xbf16>
    %c0_7 = arith.constant 0 : index
    %c0_8 = arith.constant 0 : index
    %11 = vector.load %arg9[%c0_7, %c0_8] : memref<256x81xbf16, #tpu.memory_space<vmem>>, vector<16x81xbf16>
    tpu.vector_store %arg9[%c0_7, %c0_8], %10 {strides = array<i32>} : memref<256x81xbf16, #tpu.memory_space<vmem>>, vector<16x81xbf16>,
    %12 = vector.extract_strided_slice %9 {offsets = [0, 81], sizes = [16, 81], strides = [1, 1]} : vector<16x1296xbf16> to vector<16x81xbf16>
    %c16 = arith.constant 16 : index
    %c0_9 = arith.constant 0 : index
    %13 = vector.load %arg9[%c16, %c0_9] : memref<256x81xbf16, #tpu.memory_space<vmem>>, vector<16x81xbf16>
    tpu.vector_store %arg9[%c16, %c0_9], %12 {strides = array<i32>} : memref<256x81xbf16, #tpu.memory_space<vmem>>, vector<16x81xbf16>,
    %14 = vector.extract_strided_slice %9 {offsets = [0, 162], sizes = [16, 81], strides = [1, 1]} : vector<16x1296xbf16> to vector<16x81xbf16>
    %c32 = arith.constant 32 : index
    %c0_10 = arith.constant 0 : index
    %15 = vector.load %arg9[%c32, %c0_10] : memref<256x81xbf16, #tpu.memory_space<vmem>>, vector<16x81xbf16>
    tpu.vector_store %arg9[%c32, %c0_10], %14 {strides = array<i32>} : memref<256x81xbf16, #tpu.memory_space<vmem>>, vector<16x81xbf16>,
    %16 = vector.extract_strided_slice %9 {offsets = [0, 243], sizes = [16, 81], strides = [1, 1]} : vector<16x1296xbf16> to vector<16x81xbf16>
    %c48 = arith.constant 48 : index
    %c0_11 = arith.constant 0 : index
    %17 = vector.load %arg9[%c48, %c0_11] : memref<256x81xbf16, #tpu.memory_space<vmem>>, vector<16x81xbf16>
    tpu.vector_store %arg9[%c48, %c0_11], %16 {strides = array<i32>} : memref<256x81xbf16, #tpu.memory_space<vmem>>, vector<16x81xbf16>,
    %18 = vector.extract_strided_slice %9 {offsets = [0, 324], sizes = [16, 81], strides = [1, 1]} : vector<16x1296xbf16> to vector<16x81xbf16>
    %c64 = arith.constant 64 : index
    %c0_12 = arith.constant 0 : index
    %19 = vector.load %arg9[%c64, %c0_12] : memref<256x81xbf16, #tpu.memory_space<vmem>>, vector<16x81xbf16>
    tpu.vector_store %arg9[%c64, %c0_12], %18 {strides = array<i32>} : memref<256x81xbf16, #tpu.memory_space<vmem>>, vector<16x81xbf16>,
    %20 = vector.extract_strided_slice %9 {offsets = [0, 405], sizes = [16, 81], strides = [1, 1]} : vector<16x1296xbf16> to vector<16x81xbf16>
    %c80 = arith.constant 80 : index
    %c0_13 = arith.constant 0 : index
    %21 = vector.load %arg9[%c80, %c0_13] : memref<256x81xbf16, #tpu.memory_space<vmem>>, vector<16x81xbf16>
    tpu.vector_store %arg9[%c80, %c0_13], %20 {strides = array<i32>} : memref<256x81xbf16, #tpu.memory_space<vmem>>, vector<16x81xbf16>,
    %22 = vector.extract_strided_slice %9 {offsets = [0, 486], sizes = [16, 81], strides = [1, 1]} : vector<16x1296xbf16> to vector<16x81xbf16>
    %c96 = arith.constant 96 : index
    %c0_14 = arith.constant 0 : index
    %23 = vector.load %arg9[%c96, %c0_14] : memref<256x81xbf16, #tpu.memory_space<vmem>>, vector<16x81xbf16>
    tpu.vector_store %arg9[%c96, %c0_14], %22 {strides = array<i32>} : memref<256x81xbf16, #tpu.memory_space<vmem>>, vector<16x81xbf16>,
    %24 = vector.extract_strided_slice %9 {offsets = [0, 567], sizes = [16, 81], strides = [1, 1]} : vector<16x1296xbf16> to vector<16x81xbf16>
    %c112 = arith.constant 112 : index
    %c0_15 = arith.constant 0 : index
    %25 = vector.load %arg9[%c112, %c0_15] : memref<256x81xbf16, #tpu.memory_space<vmem>>, vector<16x81xbf16>
    tpu.vector_store %arg9[%c112, %c0_15], %24 {strides = array<i32>} : memref<256x81xbf16, #tpu.memory_space<vmem>>, vector<16x81xbf16>,
    %26 = vector.extract_strided_slice %9 {offsets = [0, 648], sizes = [16, 81], strides = [1, 1]} : vector<16x1296xbf16> to vector<16x81xbf16>
    %c128 = arith.constant 128 : index
    %c0_16 = arith.constant 0 : index
    %27 = vector.load %arg9[%c128, %c0_16] : memref<256x81xbf16, #tpu.memory_space<vmem>>, vector<16x81xbf16>
    tpu.vector_store %arg9[%c128, %c0_16], %26 {strides = array<i32>} : memref<256x81xbf16, #tpu.memory_space<vmem>>, vector<16x81xbf16>,
    %28 = vector.extract_strided_slice %9 {offsets = [0, 729], sizes = [16, 81], strides = [1, 1]} : vector<16x1296xbf16> to vector<16x81xbf16>
    %c144 = arith.constant 144 : index
    %c0_17 = arith.constant 0 : index
    %29 = vector.load %arg9[%c144, %c0_17] : memref<256x81xbf16, #tpu.memory_space<vmem>>, vector<16x81xbf16>
    tpu.vector_store %arg9[%c144, %c0_17], %28 {strides = array<i32>} : memref<256x81xbf16, #tpu.memory_space<vmem>>, vector<16x81xbf16>,
    %30 = vector.extract_strided_slice %9 {offsets = [0, 810], sizes = [16, 81], strides = [1, 1]} : vector<16x1296xbf16> to vector<16x81xbf16>
    %c160 = arith.constant 160 : index
    %c0_18 = arith.constant 0 : index
    %31 = vector.load %arg9[%c160, %c0_18] : memref<256x81xbf16, #tpu.memory_space<vmem>>, vector<16x81xbf16>
    tpu.vector_store %arg9[%c160, %c0_18], %30 {strides = array<i32>} : memref<256x81xbf16, #tpu.memory_space<vmem>>, vector<16x81xbf16>,
    %32 = vector.extract_strided_slice %9 {offsets = [0, 891], sizes = [16, 81], strides = [1, 1]} : vector<16x1296xbf16> to vector<16x81xbf16>
    %c176 = arith.constant 176 : index
    %c0_19 = arith.constant 0 : index
    %33 = vector.load %arg9[%c176, %c0_19] : memref<256x81xbf16, #tpu.memory_space<vmem>>, vector<16x81xbf16>
    tpu.vector_store %arg9[%c176, %c0_19], %32 {strides = array<i32>} : memref<256x81xbf16, #tpu.memory_space<vmem>>, vector<16x81xbf16>,
    %34 = vector.extract_strided_slice %9 {offsets = [0, 972], sizes = [16, 81], strides = [1, 1]} : vector<16x1296xbf16> to vector<16x81xbf16>
    %c192 = arith.constant 192 : index
    %c0_20 = arith.constant 0 : index
    %35 = vector.load %arg9[%c192, %c0_20] : memref<256x81xbf16, #tpu.memory_space<vmem>>, vector<16x81xbf16>
    tpu.vector_store %arg9[%c192, %c0_20], %34 {strides = array<i32>} : memref<256x81xbf16, #tpu.memory_space<vmem>>, vector<16x81xbf16>,
    %36 = vector.extract_strided_slice %9 {offsets = [0, 1053], sizes = [16, 81], strides = [1, 1]} : vector<16x1296xbf16> to vector<16x81xbf16>
    %c208 = arith.constant 208 : index
    %c0_21 = arith.constant 0 : index
    %37 = vector.load %arg9[%c208, %c0_21] : memref<256x81xbf16, #tpu.memory_space<vmem>>, vector<16x81xbf16>
    tpu.vector_store %arg9[%c208, %c0_21], %36 {strides = array<i32>} : memref<256x81xbf16, #tpu.memory_space<vmem>>, vector<16x81xbf16>,
    %38 = vector.extract_strided_slice %9 {offsets = [0, 1134], sizes = [16, 81], strides = [1, 1]} : vector<16x1296xbf16> to vector<16x81xbf16>
    %c224 = arith.constant 224 : index
    %c0_22 = arith.constant 0 : index
    %39 = vector.load %arg9[%c224, %c0_22] : memref<256x81xbf16, #tpu.memory_space<vmem>>, vector<16x81xbf16>
    tpu.vector_store %arg9[%c224, %c0_22], %38 {strides = array<i32>} : memref<256x81xbf16, #tpu.memory_space<vmem>>, vector<16x81xbf16>,
    %40 = vector.extract_strided_slice %9 {offsets = [0, 1215], sizes = [16, 81], strides = [1, 1]} : vector<16x1296xbf16> to vector<16x81xbf16>
    %c240 = arith.constant 240 : index
    %c0_23 = arith.constant 0 : index
    %41 = vector.load %arg9[%c240, %c0_23] : memref<256x81xbf16, #tpu.memory_space<vmem>>, vector<16x81xbf16>
    tpu.vector_store %arg9[%c240, %c0_23], %40 {strides = array<i32>} : memref<256x81xbf16, #tpu.memory_space<vmem>>, vector<16x81xbf16>,
    %c0_24 = arith.constant 0 : index
    %c0_25 = arith.constant 0 : index
    %42 = vector.load %arg4[%c0_24, %c0_25] : memref<32x256xbf16, #tpu.memory_space<vmem>>, vector<32x256xbf16>
    %c0_26 = arith.constant 0 : index
    %c0_27 = arith.constant 0 : index
    %43 = vector.load %arg9[%c0_26, %c0_27] : memref<256x81xbf16, #tpu.memory_space<vmem>>, vector<256x81xbf16>
    %cst_28 = arith.constant dense<0.000000e+00> : vector<32x81xf32>
    %44 = tpu.matmul %42, %43, %cst_28 {dimension_numbers = #tpu.dot_dimension_numbers<[1], [0], [0], [1], [0, 0, 1, 1], [], []>} : vector<32x256xbf16>, vector<256x81xbf16>, vector<32x81xf32> -> vector<32x81xf32>
    %c0_29 = arith.constant 0 : index
    %c0_30 = arith.constant 0 : index
    %45 = vector.load %arg5[%c0_29, %c0_30] : memref<32x1xf32, #tpu.memory_space<vmem>>, vector<32x1xf32>
    %46 = vector.broadcast %45 : vector<32x1xf32> to vector<32x81xf32>
    %47 = arith.addf %44, %46 : vector<32x81xf32>
    %cst_31 = arith.constant 0.000000e+00 : f32
    %48 = vector.broadcast %cst_31 : f32 to vector<32x81xf32>
    %49 = arith.maximumf %47, %48 : vector<32x81xf32>
    %50 = vector.extract_strided_slice %49 {offsets = [0, 0], sizes = [1, 81], strides = [1, 1]} : vector<32x81xf32> to vector<1x81xf32>
    %c0_32 = arith.constant 0 : index
    %c0_33 = arith.constant 0 : index
    %51 = vector.load %arg10[%c0_32, %c0_33] : memref<1x2592xf32, #tpu.memory_space<vmem>>, vector<1x81xf32>
    tpu.vector_store %arg10[%c0_32, %c0_33], %50 {strides = array<i32>} : memref<1x2592xf32, #tpu.memory_space<vmem>>, vector<1x81xf32>,
    %52 = vector.extract_strided_slice %49 {offsets = [1, 0], sizes = [1, 81], strides = [1, 1]} : vector<32x81xf32> to vector<1x81xf32>
    %c0_34 = arith.constant 0 : index
    %c81 = arith.constant 81 : index
    %53 = vector.load %arg10[%c0_34, %c81] : memref<1x2592xf32, #tpu.memory_space<vmem>>, vector<1x81xf32>
    tpu.vector_store %arg10[%c0_34, %c81], %52 {strides = array<i32>} : memref<1x2592xf32, #tpu.memory_space<vmem>>, vector<1x81xf32>,
    %54 = vector.extract_strided_slice %49 {offsets = [2, 0], sizes = [1, 81], strides = [1, 1]} : vector<32x81xf32> to vector<1x81xf32>
    %c0_35 = arith.constant 0 : index
    %c162 = arith.constant 162 : index
    %55 = vector.load %arg10[%c0_35, %c162] : memref<1x2592xf32, #tpu.memory_space<vmem>>, vector<1x81xf32>
    tpu.vector_store %arg10[%c0_35, %c162], %54 {strides = array<i32>} : memref<1x2592xf32, #tpu.memory_space<vmem>>, vector<1x81xf32>,
    %56 = vector.extract_strided_slice %49 {offsets = [3, 0], sizes = [1, 81], strides = [1, 1]} : vector<32x81xf32> to vector<1x81xf32>
    %c0_36 = arith.constant 0 : index
    %c243 = arith.constant 243 : index
    %57 = vector.load %arg10[%c0_36, %c243] : memref<1x2592xf32, #tpu.memory_space<vmem>>, vector<1x81xf32>
    tpu.vector_store %arg10[%c0_36, %c243], %56 {strides = array<i32>} : memref<1x2592xf32, #tpu.memory_space<vmem>>, vector<1x81xf32>,
    %58 = vector.extract_strided_slice %49 {offsets = [4, 0], sizes = [1, 81], strides = [1, 1]} : vector<32x81xf32> to vector<1x81xf32>
    %c0_37 = arith.constant 0 : index
    %c324 = arith.constant 324 : index
    %59 = vector.load %arg10[%c0_37, %c324] : memref<1x2592xf32, #tpu.memory_space<vmem>>, vector<1x81xf32>
    tpu.vector_store %arg10[%c0_37, %c324], %58 {strides = array<i32>} : memref<1x2592xf32, #tpu.memory_space<vmem>>, vector<1x81xf32>,
    %60 = vector.extract_strided_slice %49 {offsets = [5, 0], sizes = [1, 81], strides = [1, 1]} : vector<32x81xf32> to vector<1x81xf32>
    %c0_38 = arith.constant 0 : index
    %c405 = arith.constant 405 : index
    %61 = vector.load %arg10[%c0_38, %c405] : memref<1x2592xf32, #tpu.memory_space<vmem>>, vector<1x81xf32>
    tpu.vector_store %arg10[%c0_38, %c405], %60 {strides = array<i32>} : memref<1x2592xf32, #tpu.memory_space<vmem>>, vector<1x81xf32>,
    %62 = vector.extract_strided_slice %49 {offsets = [6, 0], sizes = [1, 81], strides = [1, 1]} : vector<32x81xf32> to vector<1x81xf32>
    %c0_39 = arith.constant 0 : index
    %c486 = arith.constant 486 : index
    %63 = vector.load %arg10[%c0_39, %c486] : memref<1x2592xf32, #tpu.memory_space<vmem>>, vector<1x81xf32>
    tpu.vector_store %arg10[%c0_39, %c486], %62 {strides = array<i32>} : memref<1x2592xf32, #tpu.memory_space<vmem>>, vector<1x81xf32>,
    %64 = vector.extract_strided_slice %49 {offsets = [7, 0], sizes = [1, 81], strides = [1, 1]} : vector<32x81xf32> to vector<1x81xf32>
    %c0_40 = arith.constant 0 : index
    %c567 = arith.constant 567 : index
    %65 = vector.load %arg10[%c0_40, %c567] : memref<1x2592xf32, #tpu.memory_space<vmem>>, vector<1x81xf32>
    tpu.vector_store %arg10[%c0_40, %c567], %64 {strides = array<i32>} : memref<1x2592xf32, #tpu.memory_space<vmem>>, vector<1x81xf32>,
    %66 = vector.extract_strided_slice %49 {offsets = [8, 0], sizes = [1, 81], strides = [1, 1]} : vector<32x81xf32> to vector<1x81xf32>
    %c0_41 = arith.constant 0 : index
    %c648 = arith.constant 648 : index
    %67 = vector.load %arg10[%c0_41, %c648] : memref<1x2592xf32, #tpu.memory_space<vmem>>, vector<1x81xf32>
    tpu.vector_store %arg10[%c0_41, %c648], %66 {strides = array<i32>} : memref<1x2592xf32, #tpu.memory_space<vmem>>, vector<1x81xf32>,
    %68 = vector.extract_strided_slice %49 {offsets = [9, 0], sizes = [1, 81], strides = [1, 1]} : vector<32x81xf32> to vector<1x81xf32>
    %c0_42 = arith.constant 0 : index
    %c729 = arith.constant 729 : index
    %69 = vector.load %arg10[%c0_42, %c729] : memref<1x2592xf32, #tpu.memory_space<vmem>>, vector<1x81xf32>
    tpu.vector_store %arg10[%c0_42, %c729], %68 {strides = array<i32>} : memref<1x2592xf32, #tpu.memory_space<vmem>>, vector<1x81xf32>,
    %70 = vector.extract_strided_slice %49 {offsets = [10, 0], sizes = [1, 81], strides = [1, 1]} : vector<32x81xf32> to vector<1x81xf32>
    %c0_43 = arith.constant 0 : index
    %c810 = arith.constant 810 : index
    %71 = vector.load %arg10[%c0_43, %c810] : memref<1x2592xf32, #tpu.memory_space<vmem>>, vector<1x81xf32>
    tpu.vector_store %arg10[%c0_43, %c810], %70 {strides = array<i32>} : memref<1x2592xf32, #tpu.memory_space<vmem>>, vector<1x81xf32>,
    %72 = vector.extract_strided_slice %49 {offsets = [11, 0], sizes = [1, 81], strides = [1, 1]} : vector<32x81xf32> to vector<1x81xf32>
    %c0_44 = arith.constant 0 : index
    %c891 = arith.constant 891 : index
    %73 = vector.load %arg10[%c0_44, %c891] : memref<1x2592xf32, #tpu.memory_space<vmem>>, vector<1x81xf32>
    tpu.vector_store %arg10[%c0_44, %c891], %72 {strides = array<i32>} : memref<1x2592xf32, #tpu.memory_space<vmem>>, vector<1x81xf32>,
    %74 = vector.extract_strided_slice %49 {offsets = [12, 0], sizes = [1, 81], strides = [1, 1]} : vector<32x81xf32> to vector<1x81xf32>
    %c0_45 = arith.constant 0 : index
    %c972 = arith.constant 972 : index
    %75 = vector.load %arg10[%c0_45, %c972] : memref<1x2592xf32, #tpu.memory_space<vmem>>, vector<1x81xf32>
    tpu.vector_store %arg10[%c0_45, %c972], %74 {strides = array<i32>} : memref<1x2592xf32, #tpu.memory_space<vmem>>, vector<1x81xf32>,
    %76 = vector.extract_strided_slice %49 {offsets = [13, 0], sizes = [1, 81], strides = [1, 1]} : vector<32x81xf32> to vector<1x81xf32>
    %c0_46 = arith.constant 0 : index
    %c1053 = arith.constant 1053 : index
    %77 = vector.load %arg10[%c0_46, %c1053] : memref<1x2592xf32, #tpu.memory_space<vmem>>, vector<1x81xf32>
    tpu.vector_store %arg10[%c0_46, %c1053], %76 {strides = array<i32>} : memref<1x2592xf32, #tpu.memory_space<vmem>>, vector<1x81xf32>,
    %78 = vector.extract_strided_slice %49 {offsets = [14, 0], sizes = [1, 81], strides = [1, 1]} : vector<32x81xf32> to vector<1x81xf32>
    %c0_47 = arith.constant 0 : index
    %c1134 = arith.constant 1134 : index
    %79 = vector.load %arg10[%c0_47, %c1134] : memref<1x2592xf32, #tpu.memory_space<vmem>>, vector<1x81xf32>
    tpu.vector_store %arg10[%c0_47, %c1134], %78 {strides = array<i32>} : memref<1x2592xf32, #tpu.memory_space<vmem>>, vector<1x81xf32>,
    %80 = vector.extract_strided_slice %49 {offsets = [15, 0], sizes = [1, 81], strides = [1, 1]} : vector<32x81xf32> to vector<1x81xf32>
    %c0_48 = arith.constant 0 : index
    %c1215 = arith.constant 1215 : index
    %81 = vector.load %arg10[%c0_48, %c1215] : memref<1x2592xf32, #tpu.memory_space<vmem>>, vector<1x81xf32>
    tpu.vector_store %arg10[%c0_48, %c1215], %80 {strides = array<i32>} : memref<1x2592xf32, #tpu.memory_space<vmem>>, vector<1x81xf32>,
    %82 = vector.extract_strided_slice %49 {offsets = [16, 0], sizes = [1, 81], strides = [1, 1]} : vector<32x81xf32> to vector<1x81xf32>
    %c0_49 = arith.constant 0 : index
    %c1296 = arith.constant 1296 : index
    %83 = vector.load %arg10[%c0_49, %c1296] : memref<1x2592xf32, #tpu.memory_space<vmem>>, vector<1x81xf32>
    tpu.vector_store %arg10[%c0_49, %c1296], %82 {strides = array<i32>} : memref<1x2592xf32, #tpu.memory_space<vmem>>, vector<1x81xf32>,
    %84 = vector.extract_strided_slice %49 {offsets = [17, 0], sizes = [1, 81], strides = [1, 1]} : vector<32x81xf32> to vector<1x81xf32>
    %c0_50 = arith.constant 0 : index
    %c1377 = arith.constant 1377 : index
    %85 = vector.load %arg10[%c0_50, %c1377] : memref<1x2592xf32, #tpu.memory_space<vmem>>, vector<1x81xf32>
    tpu.vector_store %arg10[%c0_50, %c1377], %84 {strides = array<i32>} : memref<1x2592xf32, #tpu.memory_space<vmem>>, vector<1x81xf32>,
    %86 = vector.extract_strided_slice %49 {offsets = [18, 0], sizes = [1, 81], strides = [1, 1]} : vector<32x81xf32> to vector<1x81xf32>
    %c0_51 = arith.constant 0 : index
    %c1458 = arith.constant 1458 : index
    %87 = vector.load %arg10[%c0_51, %c1458] : memref<1x2592xf32, #tpu.memory_space<vmem>>, vector<1x81xf32>
    tpu.vector_store %arg10[%c0_51, %c1458], %86 {strides = array<i32>} : memref<1x2592xf32, #tpu.memory_space<vmem>>, vector<1x81xf32>,
    %88 = vector.extract_strided_slice %49 {offsets = [19, 0], sizes = [1, 81], strides = [1, 1]} : vector<32x81xf32> to vector<1x81xf32>
    %c0_52 = arith.constant 0 : index
    %c1539 = arith.constant 1539 : index
    %89 = vector.load %arg10[%c0_52, %c1539] : memref<1x2592xf32, #tpu.memory_space<vmem>>, vector<1x81xf32>
    tpu.vector_store %arg10[%c0_52, %c1539], %88 {strides = array<i32>} : memref<1x2592xf32, #tpu.memory_space<vmem>>, vector<1x81xf32>,
    %90 = vector.extract_strided_slice %49 {offsets = [20, 0], sizes = [1, 81], strides = [1, 1]} : vector<32x81xf32> to vector<1x81xf32>
    %c0_53 = arith.constant 0 : index
    %c1620 = arith.constant 1620 : index
    %91 = vector.load %arg10[%c0_53, %c1620] : memref<1x2592xf32, #tpu.memory_space<vmem>>, vector<1x81xf32>
    tpu.vector_store %arg10[%c0_53, %c1620], %90 {strides = array<i32>} : memref<1x2592xf32, #tpu.memory_space<vmem>>, vector<1x81xf32>,
    %92 = vector.extract_strided_slice %49 {offsets = [21, 0], sizes = [1, 81], strides = [1, 1]} : vector<32x81xf32> to vector<1x81xf32>
    %c0_54 = arith.constant 0 : index
    %c1701 = arith.constant 1701 : index
    %93 = vector.load %arg10[%c0_54, %c1701] : memref<1x2592xf32, #tpu.memory_space<vmem>>, vector<1x81xf32>
    tpu.vector_store %arg10[%c0_54, %c1701], %92 {strides = array<i32>} : memref<1x2592xf32, #tpu.memory_space<vmem>>, vector<1x81xf32>,
    %94 = vector.extract_strided_slice %49 {offsets = [22, 0], sizes = [1, 81], strides = [1, 1]} : vector<32x81xf32> to vector<1x81xf32>
    %c0_55 = arith.constant 0 : index
    %c1782 = arith.constant 1782 : index
    %95 = vector.load %arg10[%c0_55, %c1782] : memref<1x2592xf32, #tpu.memory_space<vmem>>, vector<1x81xf32>
    tpu.vector_store %arg10[%c0_55, %c1782], %94 {strides = array<i32>} : memref<1x2592xf32, #tpu.memory_space<vmem>>, vector<1x81xf32>,
    %96 = vector.extract_strided_slice %49 {offsets = [23, 0], sizes = [1, 81], strides = [1, 1]} : vector<32x81xf32> to vector<1x81xf32>
    %c0_56 = arith.constant 0 : index
    %c1863 = arith.constant 1863 : index
    %97 = vector.load %arg10[%c0_56, %c1863] : memref<1x2592xf32, #tpu.memory_space<vmem>>, vector<1x81xf32>
    tpu.vector_store %arg10[%c0_56, %c1863], %96 {strides = array<i32>} : memref<1x2592xf32, #tpu.memory_space<vmem>>, vector<1x81xf32>,
    %98 = vector.extract_strided_slice %49 {offsets = [24, 0], sizes = [1, 81], strides = [1, 1]} : vector<32x81xf32> to vector<1x81xf32>
    %c0_57 = arith.constant 0 : index
    %c1944 = arith.constant 1944 : index
    %99 = vector.load %arg10[%c0_57, %c1944] : memref<1x2592xf32, #tpu.memory_space<vmem>>, vector<1x81xf32>
    tpu.vector_store %arg10[%c0_57, %c1944], %98 {strides = array<i32>} : memref<1x2592xf32, #tpu.memory_space<vmem>>, vector<1x81xf32>,
    %100 = vector.extract_strided_slice %49 {offsets = [25, 0], sizes = [1, 81], strides = [1, 1]} : vector<32x81xf32> to vector<1x81xf32>
    %c0_58 = arith.constant 0 : index
    %c2025 = arith.constant 2025 : index
    %101 = vector.load %arg10[%c0_58, %c2025] : memref<1x2592xf32, #tpu.memory_space<vmem>>, vector<1x81xf32>
    tpu.vector_store %arg10[%c0_58, %c2025], %100 {strides = array<i32>} : memref<1x2592xf32, #tpu.memory_space<vmem>>, vector<1x81xf32>,
    %102 = vector.extract_strided_slice %49 {offsets = [26, 0], sizes = [1, 81], strides = [1, 1]} : vector<32x81xf32> to vector<1x81xf32>
    %c0_59 = arith.constant 0 : index
    %c2106 = arith.constant 2106 : index
    %103 = vector.load %arg10[%c0_59, %c2106] : memref<1x2592xf32, #tpu.memory_space<vmem>>, vector<1x81xf32>
    tpu.vector_store %arg10[%c0_59, %c2106], %102 {strides = array<i32>} : memref<1x2592xf32, #tpu.memory_space<vmem>>, vector<1x81xf32>,
    %104 = vector.extract_strided_slice %49 {offsets = [27, 0], sizes = [1, 81], strides = [1, 1]} : vector<32x81xf32> to vector<1x81xf32>
    %c0_60 = arith.constant 0 : index
    %c2187 = arith.constant 2187 : index
    %105 = vector.load %arg10[%c0_60, %c2187] : memref<1x2592xf32, #tpu.memory_space<vmem>>, vector<1x81xf32>
    tpu.vector_store %arg10[%c0_60, %c2187], %104 {strides = array<i32>} : memref<1x2592xf32, #tpu.memory_space<vmem>>, vector<1x81xf32>,
    %106 = vector.extract_strided_slice %49 {offsets = [28, 0], sizes = [1, 81], strides = [1, 1]} : vector<32x81xf32> to vector<1x81xf32>
    %c0_61 = arith.constant 0 : index
    %c2268 = arith.constant 2268 : index
    %107 = vector.load %arg10[%c0_61, %c2268] : memref<1x2592xf32, #tpu.memory_space<vmem>>, vector<1x81xf32>
    tpu.vector_store %arg10[%c0_61, %c2268], %106 {strides = array<i32>} : memref<1x2592xf32, #tpu.memory_space<vmem>>, vector<1x81xf32>,
    %108 = vector.extract_strided_slice %49 {offsets = [29, 0], sizes = [1, 81], strides = [1, 1]} : vector<32x81xf32> to vector<1x81xf32>
    %c0_62 = arith.constant 0 : index
    %c2349 = arith.constant 2349 : index
    %109 = vector.load %arg10[%c0_62, %c2349] : memref<1x2592xf32, #tpu.memory_space<vmem>>, vector<1x81xf32>
    tpu.vector_store %arg10[%c0_62, %c2349], %108 {strides = array<i32>} : memref<1x2592xf32, #tpu.memory_space<vmem>>, vector<1x81xf32>,
    %110 = vector.extract_strided_slice %49 {offsets = [30, 0], sizes = [1, 81], strides = [1, 1]} : vector<32x81xf32> to vector<1x81xf32>
    %c0_63 = arith.constant 0 : index
    %c2430 = arith.constant 2430 : index
    %111 = vector.load %arg10[%c0_63, %c2430] : memref<1x2592xf32, #tpu.memory_space<vmem>>, vector<1x81xf32>
    tpu.vector_store %arg10[%c0_63, %c2430], %110 {strides = array<i32>} : memref<1x2592xf32, #tpu.memory_space<vmem>>, vector<1x81xf32>,
    %112 = vector.extract_strided_slice %49 {offsets = [31, 0], sizes = [1, 81], strides = [1, 1]} : vector<32x81xf32> to vector<1x81xf32>
    %c0_64 = arith.constant 0 : index
    %c2511 = arith.constant 2511 : index
    %113 = vector.load %arg10[%c0_64, %c2511] : memref<1x2592xf32, #tpu.memory_space<vmem>>, vector<1x81xf32>
    tpu.vector_store %arg10[%c0_64, %c2511], %112 {strides = array<i32>} : memref<1x2592xf32, #tpu.memory_space<vmem>>, vector<1x81xf32>,
    %c0_65 = arith.constant 0 : index
    %c0_66 = arith.constant 0 : index
    %114 = vector.load %arg10[%c0_65, %c0_66] : memref<1x2592xf32, #tpu.memory_space<vmem>>, vector<1x2592xf32>
    %115 = arith.truncf %114 : vector<1x2592xf32> to vector<1x2592xbf16>
    %c0_67 = arith.constant 0 : index
    %c0_68 = arith.constant 0 : index
    %116 = vector.load %arg6[%c0_67, %c0_68] : memref<2592x64xbf16, #tpu.memory_space<vmem>>, vector<2592x64xbf16>
    %cst_69 = arith.constant dense<0.000000e+00> : vector<1x64xf32>
    %117 = tpu.matmul %115, %116, %cst_69 {dimension_numbers = #tpu.dot_dimension_numbers<[1], [0], [0], [1], [0, 0, 1, 1], [], []>} : vector<1x2592xbf16>, vector<2592x64xbf16>, vector<1x64xf32> -> vector<1x64xf32>
    %c0_70 = arith.constant 0 : index
    %c0_71 = arith.constant 0 : index
    %118 = vector.load %arg7[%c0_70, %c0_71] : memref<1x64xf32, #tpu.memory_space<vmem>>, vector<1x64xf32>
    %119 = arith.addf %117, %118 : vector<1x64xf32>
    %cst_72 = arith.constant 0.000000e+00 : f32
    %120 = vector.broadcast %cst_72 : f32 to vector<1x64xf32>
    %121 = arith.maximumf %119, %120 : vector<1x64xf32>
    %c0_73 = arith.constant 0 : index
    %c0_74 = arith.constant 0 : index
    %c0_75 = arith.constant 0 : index
    %122 = vector.load %arg8[%c0_73, %c0_74, %c0_75] : memref<1x1x64xf32, #tpu.memory_space<vmem>>, vector<1x1x64xf32>
    %123 = vector.shape_cast %122 : vector<1x1x64xf32> to vector<1x64xf32>
    %124 = vector.shape_cast %121 : vector<1x64xf32> to vector<1x1x64xf32>
    tpu.vector_store %arg8[%c0_73, %c0_74, %c0_75], %124 {strides = array<i32>} : memref<1x1x64xf32, #tpu.memory_space<vmem>>, vector<1x1x64xf32>,
    return
  }
  func.func @transform_0(%arg0: i32) -> (i32, i32, i32) {
    %c0_i32 = arith.constant 0 : i32
    %c0_i32_0 = arith.constant 0 : i32
    %c0_i32_1 = arith.constant 0 : i32
    return %arg0, %c0_i32, %c0_i32_0 : i32, i32, i32
  }
  func.func @transform_1(%arg0: i32) -> (i32, i32) {
    %c0_i32 = arith.constant 0 : i32
    %c0_i32_0 = arith.constant 0 : i32
    %c0_i32_1 = arith.constant 0 : i32
    return %c0_i32, %c0_i32_0 : i32, i32
  }
  func.func @transform_2(%arg0: i32) -> (i32, i32) {
    %c0_i32 = arith.constant 0 : i32
    %c0_i32_0 = arith.constant 0 : i32
    %c0_i32_1 = arith.constant 0 : i32
    return %c0_i32, %c0_i32_0 : i32, i32
  }
  func.func @transform_3(%arg0: i32) -> (i32, i32) {
    %c0_i32 = arith.constant 0 : i32
    %c0_i32_0 = arith.constant 0 : i32
    %c0_i32_1 = arith.constant 0 : i32
    return %c0_i32, %c0_i32_0 : i32, i32
  }
  func.func @transform_4(%arg0: i32) -> (i32, i32) {
    %c0_i32 = arith.constant 0 : i32
    %c0_i32_0 = arith.constant 0 : i32
    %c0_i32_1 = arith.constant 0 : i32
    return %c0_i32, %c0_i32_0 : i32, i32
  }
  func.func @transform_5(%arg0: i32) -> (i32, i32) {
    %c0_i32 = arith.constant 0 : i32
    %c0_i32_0 = arith.constant 0 : i32
    %c0_i32_1 = arith.constant 0 : i32
    return %c0_i32, %c0_i32_0 : i32, i32
  }
  func.func @transform_6(%arg0: i32) -> (i32, i32) {
    %c0_i32 = arith.constant 0 : i32
    %c0_i32_0 = arith.constant 0 : i32
    %c0_i32_1 = arith.constant 0 : i32
    return %c0_i32, %c0_i32_0 : i32, i32
  }
  func.func @transform_7(%arg0: i32) -> (i32, i32, i32) {
    %c0_i32 = arith.constant 0 : i32
    %c0_i32_0 = arith.constant 0 : i32
    %c0_i32_1 = arith.constant 0 : i32
    return %arg0, %c0_i32, %c0_i32_0 : i32, i32, i32
  }
}

</mosaic_0001>

<bundles_post_ra>
// kernel: percept_forward.1
= control target key start
LH: loop header
LB: loop body
LE: loop exit
PB: predicated region body
PF: predicated region fallthrough
CT: control target
= control target key end

     0   :  { %12 = vsyncpa [#allocation5], 0  ;;  %s7100_s0 = inlined_call_operand.vmem [shape: bf16[2,192,1296], index: 0, kind: input, shape index: {}]   ;;  %s7101_s1 = inlined_call_operand.vmem [shape: bf16[16,192], index: 1, kind: input, shape index: {}]   ;;  %s7102_s2 = inlined_call_operand.vmem [shape: f32[16,1], index: 2, kind: input, shape index: {}]   ;;  %s7103_s3 = inlined_call_operand.vmem [shape: bf16[32,256], index: 3, kind: input, shape index: {}]   ;;  %s7104_s4 = inlined_call_operand.vmem [shape: f32[32,1], index: 4, kind: input, shape index: {}]   ;;  %s7105_s5 = inlined_call_operand.vmem [shape: bf16[2592,64], index: 5, kind: input, shape index: {}]   ;;  %s7106_s6 = inlined_call_operand.vmem [shape: f32[1,64], index: 6, kind: input, shape index: {}]   ;;  %s7107_s7 = inlined_call_operand.hbm [shape: f32[2,1,64], index: 7, kind: output, shape index: {}]  }
   0x1   :  { %14 = vsyncpa [#allocation5 + $0x1], 0  ;;  %s5582_s24 = smov 0   ;;  %s5584_s25 = smov 0  }
   0x2   :  { %s5586_s26 = smov 0   ;;  %s5588_s27 = smov 0  }
   0x3 LB: > { %s5603_s28 = sadd.s32 4294967295, %s5489_s27   ;;  %s4304_s29 = sadd.s32 4294967294, %s5489_s27   ;;  %s5489_s27 = sphi %s5588_s27, %s7233_s27   ;;  %s5485_s26 = sphi %s5586_s26, %s7232_s26   ;;  %s5481_s25 = sphi %s5584_s25, %s7231_s25   ;;  %s5477_s24 = sphi %s5582_s24, %s7230_s24  }
   0x4   : > { %s5607_s30 = sadd.s32 1, %s5489_s27   ;;  %s179_s8 = sadd.s32 1, %s5485_s26 }
   0x5   : > { %s176_s9 = ssub.s32 %s5489_s27, %s5607_s30  ;;  %p189_p0 = scmp.ne.s32.totalorder %s5485_s26, %s5481_s25 }
   0x6   : > { %p177_p1 = scmp.eq.s32.totalorder %s176_s9, 0  ;;  %p190_p2 = scmp.eq.s32.totalorder %s5603_s28, 1 }
   0x7   : > { %p195_p3 = scmp.ne.s32.totalorder %s5481_s25, %s5477_s24  ;;  %p196_p4 = scmp.eq.s32.totalorder %s4304_s29, 1 }
   0x8   : > { %s5618_s10 = scalar_select %p177_p1, %s5485_s26, %s179_s8  }
   0x9   : > { %p5620_p5 = por %p190_p2, %p189_p0  ;;  %p5624_p6 = por %p196_p4, %p195_p3 }
   0xa   : > { %p4307_p7 = scmp.ge.s32.totalorder %s5489_s27, 1  ;;  %p240_p8 = scmp.lt.s32.totalorder %s5489_s27, 3 }
   0xc   : > { %p241_p9 = pnand %p4307_p7, %p240_p8 }
   0xd   : > { %p271_p10 = scmp.lt.s32.totalorder (!%p241_p9), %s5603_s28, 1  ;;  %s5492_s9 = smov (!%p241_p9), 107  }
   0xe   : > { %244 = sbr.rel (%p241_p9) target bundleno = 1251 (0x4e3), region = 48  ;;  %s5493_s13 = smov (!%p241_p9), 60  }
   0xf   : > { %s5494_s14 = smov (!%p241_p9), 26   ;;  %s5495_s15 = smov (!%p241_p9), 73  }
  0x10   : > { %s5496_s16 = smov (!%p241_p9), 99   ;;  %s5499_s19 = smov (!%p241_p9), 18  }
  0x11   : > { %s5500_s20 = smov (!%p241_p9), 5   ;;  %s5501_s21 = smov (!%p241_p9), 13  }
  0x12   : > { %s5502_s22 = smov (!%p241_p9), 86   ;;  %s5504_s29 = smov (!%p241_p9), 39  }
  0x13   : > { %v5634_v0 = vld [vmem:[%s7101_s1 + $0x4] ss:$8 sps:$4 sm:$0xff]   ;;  %vm1116_vm0 = vcmask 523264   ;;  %s272_s17 = scalar_select %p271_p10, %s5603_s28, 1  ;;  %v5491_v2 = vmov 0   ;;  %vm1416_vm1 = vcmask 658432  }
  0x14   : > { %v423_v1 = vld [vmem:[%s7102_s2] sm:$0xff]  ;;  %4443 = vmatprep.mubr.msk.bf16.mxu0 %vm1116_vm0, %v5634_v0  ;;  %4444 = vmatprep.mubr.msk.bf16.mxu1 %vm1116_vm0, %v5634_v0  ;;  %v424_v3 = vld [vmem:[%s7102_s2 + $0x8] sm:$0xff]  ;;  %vm1476_vm2 = vcmask 490496   ;;  %s5505_s8 = smov 47   ;;  %vm1504_vm3 = vcmask 211968   ;;  %vm1522_vm4 = vcmask 596992  }
  0x15   : > { %5048 = vset.pattern.permute.xlu0 %v5491_v2  ;;  %5049 = vset.pattern.permute.xlu1 %v5491_v2  ;;  %s4958_s18 = smul.u32 1056, %s272_s17  ;;  %v5707_v54 = vld [vmem:[%s7101_s1] ss:$8 sps:$4 sm:$0xff]   ;;  %s5497_s17 = smov 65   ;;  %vm1642_vm5 = vcmask 531456   ;;  %vm1596_vm6 = vcmask 424960  }
  0x16   : > { %427 = vperm.xlu0 %5048, %v423_v1   ;;  %vm1624_vm7 = vcmask 146432   ;;  %vm1578_vm8 = vcmask 39936   ;;  %vm1458_vm9 = vcmask 105472   ;;  %vm1550_vm10 = vcmask 318464  }
  0x17   : > { %s5652_s23 = scalar_lea.vmem %s7100_s0, %s4958_s18  ;;  %s5498_s18 = smov 52   ;;  %vm1430_vm11 = vcmask 384000  }
  0x18   : > { %v5050_v4 = vld [vmem:[%s5652_s23 + $0x26c] ss:$44 sps:$4 sm:$0xff]   ;;  %v5052_v5 = vld [vmem:[%s5652_s23 + $0x274] ss:$44 sps:$4 sm:$0xff]   ;;  %v5055_v7 = vld [vmem:[%s5652_s23 + $0x270] ss:$44 sps:$4 sm:$0xff]  }
  0x19   : > { %1120 = vmatprep.subr.bf16.mxu0 %v5050_v4  ;;  %v5054_v6 = vld [vmem:[%s5652_s23 + $0x268] ss:$44 sps:$4 sm:$0xff]   ;;  %1163 = vmatprep.subr.bf16.mxu1 %v5052_v5  ;;  %v5060_v10 = vld [vmem:[%s5652_s23 + $0x210] ss:$44 sps:$4 sm:$0xff]   ;;  %v5061_v11 = vld [vmem:[%s5652_s23 + $0x218] ss:$44 sps:$4 sm:$0xff]  }
  0x1a   : > { %432 = vperm.xlu0 %5048, %v424_v3   ;;  %v5056_v8 = vld [vmem:[%s5652_s23 + $0x214] ss:$44 sps:$4 sm:$0xff]   ;;  %1121 = vmatpush1.bf16.msra.mxu0 %v5054_v6  ;;  %v5058_v9 = vld [vmem:[%s5652_s23 + $0x21c] ss:$44 sps:$4 sm:$0xff]   ;;  %v5064_v13 = vld [vmem:[%s5652_s23 + $0x1c4] ss:$44 sps:$4 sm:$0xff]  }
  0x1b   : > { %1164 = vmatpush1.bf16.msra.mxu1 %v5055_v7  ;;  %1122 = vmatprep.subr.bf16.mxu0 %v5056_v8  ;;  %v5062_v12 = vld [vmem:[%s5652_s23 + $0x1bc] ss:$44 sps:$4 sm:$0xff]   ;;  %v5066_v14 = vld [vmem:[%s5652_s23 + $0x1b8] ss:$44 sps:$4 sm:$0xff]   ;;  %v5067_v15 = vld [vmem:[%s5652_s23 + $0x1c0] ss:$44 sps:$4 sm:$0xff]  }
  0x1c   : > { %1165 = vmatprep.subr.bf16.mxu1 %v5058_v9  ;;  %v5068_v16 = vld [vmem:[%s5652_s23 + $0x164] ss:$44 sps:$4 sm:$0xff]   ;;  %v5070_v17 = vld [vmem:[%s5652_s23 + $0x16c] ss:$44 sps:$4 sm:$0xff]   ;;  %v5073_v19 = vld [vmem:[%s5652_s23 + $0x168] ss:$44 sps:$4 sm:$0xff]  }
  0x1d   : > { %v5072_v18 = vld [vmem:[%s5652_s23 + $0x160] ss:$44 sps:$4 sm:$0xff]   ;;  %v5078_v22 = vld [vmem:[%s5652_s23 + $0x108] ss:$44 sps:$4 sm:$0xff]   ;;  %v5079_v23 = vld [vmem:[%s5652_s23 + $0x110] ss:$44 sps:$4 sm:$0xff]  }
  0x1e   : > { %1123 = vmatpush1.bf16.msra.mxu0 %v5060_v10  ;;  %v5074_v20 = vld [vmem:[%s5652_s23 + $0x10c] ss:$44 sps:$4 sm:$0xff]   ;;  %v5076_v21 = vld [vmem:[%s5652_s23 + $0x114] ss:$44 sps:$4 sm:$0xff]   ;;  %v5082_v25 = vld [vmem:[%s5652_s23 + $0xbc] ss:$44 sps:$4 sm:$0xff]  }
  0x1f   : > { %1166 = vmatpush1.bf16.msra.mxu1 %v5061_v11  ;;  %1124 = vmatprep.subr.bf16.mxu0 %v5062_v12  ;;  %v5080_v24 = vld [vmem:[%s5652_s23 + $0xb4] ss:$44 sps:$4 sm:$0xff]   ;;  %v5084_v26 = vld [vmem:[%s5652_s23 + $0xb0] ss:$44 sps:$4 sm:$0xff]   ;;  %v5085_v27 = vld [vmem:[%s5652_s23 + $0xb8] ss:$44 sps:$4 sm:$0xff]  }
  0x20   : > { %1167 = vmatprep.subr.bf16.mxu1 %v5064_v13  ;;  %v5086_v28 = vld [vmem:[%s5652_s23 + $0x5c] ss:$44 sps:$4 sm:$0xff]   ;;  %v5088_v29 = vld [vmem:[%s5652_s23 + $0x64] ss:$44 sps:$4 sm:$0xff]   ;;  %v5091_v31 = vld [vmem:[%s5652_s23 + $0x60] ss:$44 sps:$4 sm:$0xff]  }
  0x21   : > { %v5090_v30 = vld [vmem:[%s5652_s23 + $0x58] ss:$44 sps:$4 sm:$0xff]   ;;  %v5096_v34 = vld [vmem:[%s5652_s23] ss:$44 sps:$4 sm:$0xff]   ;;  %v5097_v35 = vld [vmem:[%s5652_s23 + $0x8] ss:$44 sps:$4 sm:$0xff]  }
  0x22   : > { %1125 = vmatpush1.bf16.msra.mxu0 %v5066_v14  ;;  %v5092_v32 = vld [vmem:[%s5652_s23 + $0x4] ss:$44 sps:$4 sm:$0xff]   ;;  %v5094_v33 = vld [vmem:[%s5652_s23 + $0xc] ss:$44 sps:$4 sm:$0xff]   ;;  %v5100_v37 = vld [vmem:[%s5652_s23 + $0x3d4] ss:$44 sps:$4 sm:$0xff]  }
  0x23   : > { %1168 = vmatpush1.bf16.msra.mxu1 %v5067_v15  ;;  %1126 = vmatprep.subr.bf16.mxu0 %v5068_v16  ;;  %v5098_v36 = vld [vmem:[%s5652_s23 + $0x3cc] ss:$44 sps:$4 sm:$0xff]   ;;  %v5102_v38 = vld [vmem:[%s5652_s23 + $0x3c8] ss:$44 sps:$4 sm:$0xff]   ;;  %v5103_v39 = vld [vmem:[%s5652_s23 + $0x3d0] ss:$44 sps:$4 sm:$0xff]  }
  0x24   : > { %1169 = vmatprep.subr.bf16.mxu1 %v5070_v17  ;;  %v5104_v40 = vld [vmem:[%s5652_s23 + $0x374] ss:$44 sps:$4 sm:$0xff]   ;;  %v5106_v41 = vld [vmem:[%s5652_s23 + $0x37c] ss:$44 sps:$4 sm:$0xff]   ;;  %v5109_v43 = vld [vmem:[%s5652_s23 + $0x378] ss:$44 sps:$4 sm:$0xff]  }
  0x25   : > { %v5108_v42 = vld [vmem:[%s5652_s23 + $0x370] ss:$44 sps:$4 sm:$0xff]   ;;  %v5114_v46 = vld [vmem:[%s5652_s23 + $0x318] ss:$44 sps:$4 sm:$0xff]   ;;  %v5115_v47 = vld [vmem:[%s5652_s23 + $0x320] ss:$44 sps:$4 sm:$0xff]  }
  0x26   : > { %1127 = vmatpush1.bf16.msra.mxu0 %v5072_v18  ;;  %v5110_v44 = vld [vmem:[%s5652_s23 + $0x31c] ss:$44 sps:$4 sm:$0xff]   ;;  %v5112_v45 = vld [vmem:[%s5652_s23 + $0x324] ss:$44 sps:$4 sm:$0xff]   ;;  %v5118_v49 = vld [vmem:[%s5652_s23 + $0x2cc] ss:$44 sps:$4 sm:$0xff]  }
  0x27   : > { %1170 = vmatpush1.bf16.msra.mxu1 %v5073_v19  ;;  %1128 = vmatprep.subr.bf16.mxu0 %v5074_v20  ;;  %v5116_v48 = vld [vmem:[%s5652_s23 + $0x2c4] ss:$44 sps:$4 sm:$0xff]   ;;  %v5120_v50 = vld [vmem:[%s5652_s23 + $0x2c0] ss:$44 sps:$4 sm:$0xff]   ;;  %v5121_v51 = vld [vmem:[%s5652_s23 + $0x2c8] ss:$44 sps:$4 sm:$0xff]  }
  0x28   : > { %1171 = vmatprep.subr.bf16.mxu1 %v5076_v21  ;;  %v5127_v52 = vld [vmem:[%s5652_s23 + $0x27c] ss:$44 sps:$4 sm:$0xff]   ;;  %v5130_v53 = vld [vmem:[%s5652_s23 + $0x284] ss:$44 sps:$4 sm:$0xff]   ;;  %v5128_v56 = vld [vmem:[%s5652_s23 + $0x280] ss:$44 sps:$4 sm:$0xff]  }
  0x29   : > { %v5125_v55 = vld [vmem:[%s5652_s23 + $0x278] ss:$44 sps:$4 sm:$0xff]   ;;  %v5131_v59 = vld [vmem:[%s5652_s23 + $0x220] ss:$44 sps:$4 sm:$0xff]   ;;  %v5134_v60 = vld [vmem:[%s5652_s23 + $0x228] ss:$44 sps:$4 sm:$0xff]  }
  0x2a   : > { %1129 = vmatpush1.bf16.msra.mxu0 %v5078_v22  ;;  %v5133_v57 = vld [vmem:[%s5652_s23 + $0x224] ss:$44 sps:$4 sm:$0xff]   ;;  %v5136_v58 = vld [vmem:[%s5652_s23 + $0x22c] ss:$44 sps:$4 sm:$0xff]   ;;  %v5142_v62 = vld [vmem:[%s5652_s23 + $0x1d4] ss:$44 sps:$4 sm:$0xff]  }
  0x2b   : > { %1172 = vmatpush1.bf16.msra.mxu1 %v5079_v23  ;;  %1130 = vmatprep.subr.bf16.mxu0 %v5080_v24  ;;  %v5139_v61 = vld [vmem:[%s5652_s23 + $0x1cc] ss:$44 sps:$4 sm:$0xff]   ;;  %v5137_v63 = vld [vmem:[%s5652_s23 + $0x1c8] ss:$44 sps:$4 sm:$0xff]   ;;  %v5140_v1 = vld [vmem:[%s5652_s23 + $0x1d0] ss:$44 sps:$4 sm:$0xff]  }
  0x2c   : > { %1173 = vmatprep.subr.bf16.mxu1 %v5082_v25  ;;  %v5145_v3 = vld [vmem:[%s5652_s23 + $0x174] ss:$44 sps:$4 sm:$0xff]   ;;  %v5148_v4 = vld [vmem:[%s5652_s23 + $0x17c] ss:$44 sps:$4 sm:$0xff]   ;;  %v5146_v6 = vld [vmem:[%s5652_s23 + $0x178] ss:$44 sps:$4 sm:$0xff]  }
  0x2d   : > { %v5143_v5 = vld [vmem:[%s5652_s23 + $0x170] ss:$44 sps:$4 sm:$0xff]   ;;  %v5149_v9 = vld [vmem:[%s5652_s23 + $0x118] ss:$44 sps:$4 sm:$0xff]   ;;  %v5152_v10 = vld [vmem:[%s5652_s23 + $0x120] ss:$44 sps:$4 sm:$0xff]  }
  0x2e   : > { %1131 = vmatpush1.bf16.msra.mxu0 %v5084_v26  ;;  %v5151_v7 = vld [vmem:[%s5652_s23 + $0x11c] ss:$44 sps:$4 sm:$0xff]   ;;  %v5154_v8 = vld [vmem:[%s5652_s23 + $0x124] ss:$44 sps:$4 sm:$0xff]   ;;  %v5160_v12 = vld [vmem:[%s5652_s23 + $0xcc] ss:$44 sps:$4 sm:$0xff]  }
  0x2f   : > { %1174 = vmatpush1.bf16.msra.mxu1 %v5085_v27  ;;  %1132 = vmatprep.subr.bf16.mxu0 %v5086_v28  ;;  %v5157_v11 = vld [vmem:[%s5652_s23 + $0xc4] ss:$44 sps:$4 sm:$0xff]   ;;  %v5155_v13 = vld [vmem:[%s5652_s23 + $0xc0] ss:$44 sps:$4 sm:$0xff]   ;;  %v5158_v14 = vld [vmem:[%s5652_s23 + $0xc8] ss:$44 sps:$4 sm:$0xff]  }
  0x30   : > { %1175 = vmatprep.subr.bf16.mxu1 %v5088_v29  ;;  %v5163_v15 = vld [vmem:[%s5652_s23 + $0x6c] ss:$44 sps:$4 sm:$0xff]   ;;  %v5166_v16 = vld [vmem:[%s5652_s23 + $0x74] ss:$44 sps:$4 sm:$0xff]   ;;  %v5164_v18 = vld [vmem:[%s5652_s23 + $0x70] ss:$44 sps:$4 sm:$0xff]  }
  0x31   : > { %v5161_v17 = vld [vmem:[%s5652_s23 + $0x68] ss:$44 sps:$4 sm:$0xff]   ;;  %v5167_v21 = vld [vmem:[%s5652_s23 + $0x10] ss:$44 sps:$4 sm:$0xff]   ;;  %v5170_v22 = vld [vmem:[%s5652_s23 + $0x18] ss:$44 sps:$4 sm:$0xff]  }
  0x32   : > { %1133 = vmatpush1.bf16.msra.mxu0 %v5090_v30  ;;  %v5169_v19 = vld [vmem:[%s5652_s23 + $0x14] ss:$44 sps:$4 sm:$0xff]   ;;  %v5172_v20 = vld [vmem:[%s5652_s23 + $0x1c] ss:$44 sps:$4 sm:$0xff]   ;;  %v5178_v24 = vld [vmem:[%s5652_s23 + $0x3e4] ss:$44 sps:$4 sm:$0xff]  }
  0x33   : > { %1176 = vmatpush1.bf16.msra.mxu1 %v5091_v31  ;;  %1134 = vmatprep.subr.bf16.mxu0 %v5092_v32  ;;  %v5175_v23 = vld [vmem:[%s5652_s23 + $0x3dc] ss:$44 sps:$4 sm:$0xff]   ;;  %v5173_v25 = vld [vmem:[%s5652_s23 + $0x3d8] ss:$44 sps:$4 sm:$0xff]   ;;  %v5176_v26 = vld [vmem:[%s5652_s23 + $0x3e0] ss:$44 sps:$4 sm:$0xff]  }
  0x34   : > { %1177 = vmatprep.subr.bf16.mxu1 %v5094_v33  ;;  %v5181_v27 = vld [vmem:[%s5652_s23 + $0x384] ss:$44 sps:$4 sm:$0xff]   ;;  %v5184_v28 = vld [vmem:[%s5652_s23 + $0x38c] ss:$44 sps:$4 sm:$0xff]   ;;  %v5182_v30 = vld [vmem:[%s5652_s23 + $0x388] ss:$44 sps:$4 sm:$0xff]  }
  0x35   : > { %v5179_v29 = vld [vmem:[%s5652_s23 + $0x380] ss:$44 sps:$4 sm:$0xff]   ;;  %v5185_v33 = vld [vmem:[%s5652_s23 + $0x328] ss:$44 sps:$4 sm:$0xff]  }
  0x36   : > { %1135 = vmatpush1.bf16.msra.mxu0 %v5096_v34  ;;  %v5187_v31 = vld [vmem:[%s5652_s23 + $0x32c] ss:$44 sps:$4 sm:$0xff]   ;;  %v5190_v32 = vld [vmem:[%s5652_s23 + $0x334] ss:$44 sps:$4 sm:$0xff]   ;;  %v5188_v34 = vld [vmem:[%s5652_s23 + $0x330] ss:$44 sps:$4 sm:$0xff]  }
  0x37   : > { %1178 = vmatpush1.bf16.msra.mxu1 %v5097_v35  ;;  %1144 = vmatprep.subr.bf16.mxu0 %v5098_v36  ;;  %v5193_v35 = vld [vmem:[%s5652_s23 + $0x2d4] ss:$44 sps:$4 sm:$0xff]   ;;  %v5196_v36 = vld [vmem:[%s5652_s23 + $0x2dc] ss:$44 sps:$4 sm:$0xff]  }
  0x38   : > { %1187 = vmatprep.subr.bf16.mxu1 %v5100_v37  ;;  %v5191_v37 = vld [vmem:[%s5652_s23 + $0x2d0] ss:$44 sps:$4 sm:$0xff]  }
  0x3a   : > { %1145 = vmatpush2.bf16.msra.mxu0 %v5102_v38  ;;  %v5194_v38 = vld [vmem:[%s5652_s23 + $0x2d8] ss:$44 sps:$4 sm:$0xff]  }
  0x3b   : > { %1188 = vmatpush2.bf16.msra.mxu1 %v5103_v39  ;;  %1146 = vmatprep.subr.bf16.mxu0 %v5104_v40  ;;  %v5199_v39 = vld [vmem:[%s5652_s23 + $0x28c] ss:$44 sps:$4 sm:$0xff]   ;;  %v5197_v40 = vld [vmem:[%s5652_s23 + $0x288] ss:$44 sps:$4 sm:$0xff]  }
  0x3c   : > { %1189 = vmatprep.subr.bf16.mxu1 %v5106_v41  ;;  %v5200_v41 = vld [vmem:[%s5652_s23 + $0x290] ss:$44 sps:$4 sm:$0xff]  }
  0x3e   : > { %1147 = vmatpush2.bf16.msra.mxu0 %v5108_v42  ;;  %v5203_v42 = vld [vmem:[%s5652_s23 + $0x234] ss:$44 sps:$4 sm:$0xff]  }
  0x3f   : > { %1190 = vmatpush2.bf16.msra.mxu1 %v5109_v43  ;;  %1148 = vmatprep.subr.bf16.mxu0 %v5110_v44  ;;  %v5201_v43 = vld [vmem:[%s5652_s23 + $0x230] ss:$44 sps:$4 sm:$0xff]   ;;  %v5204_v44 = vld [vmem:[%s5652_s23 + $0x238] ss:$44 sps:$4 sm:$0xff]  }
  0x40   : > { %1191 = vmatprep.subr.bf16.mxu1 %v5112_v45  ;;  %v5207_v45 = vld [vmem:[%s5652_s23 + $0x1dc] ss:$44 sps:$4 sm:$0xff]  }
  0x42   : > { %1149 = vmatpush2.bf16.msra.mxu0 %v5114_v46  ;;  %v5205_v46 = vld [vmem:[%s5652_s23 + $0x1d8] ss:$44 sps:$4 sm:$0xff]  }
  0x43   : > { %1192 = vmatpush2.bf16.msra.mxu1 %v5115_v47  ;;  %1150 = vmatprep.subr.bf16.mxu0 %v5116_v48  ;;  %v5208_v47 = vld [vmem:[%s5652_s23 + $0x1e0] ss:$44 sps:$4 sm:$0xff]   ;;  %v5211_v48 = vld [vmem:[%s5652_s23 + $0x184] ss:$44 sps:$4 sm:$0xff]  }
  0x44   : > { %1193 = vmatprep.subr.bf16.mxu1 %v5118_v49  ;;  %v5209_v49 = vld [vmem:[%s5652_s23 + $0x180] ss:$44 sps:$4 sm:$0xff]  }
  0x46   : > { %1151 = vmatpush2.bf16.msra.mxu0 %v5120_v50  ;;  %v5212_v50 = vld [vmem:[%s5652_s23 + $0x188] ss:$44 sps:$4 sm:$0xff]  }
  0x47   : > { %1194 = vmatpush2.bf16.msra.mxu1 %v5121_v51  ;;  %1206 = vmatprep.subr.bf16.mxu0 %v5127_v52  ;;  %v5215_v51 = vld [vmem:[%s5652_s23 + $0x12c] ss:$44 sps:$4 sm:$0xff]   ;;  %v5216_v52 = vld [vmem:[%s5652_s23 + $0x130] ss:$44 sps:$4 sm:$0xff]  }
  0x48   : > { %1249 = vmatprep.subr.bf16.mxu1 %v5130_v53  ;;  %v5219_v53 = vld [vmem:[%s5652_s23 + $0xd4] ss:$44 sps:$4 sm:$0xff]  }
  0x49   : > { %1153 = vmatmul.mubr.bf16.vlgmr.msra.gmra.mxu0 %v5707_v54 }
  0x4a   : > { %1196 = vmatmul.mubr.bf16.vlgmr.msra.gmra.mxu1 %v5707_v54  ;;  %1207 = vmatpush1.bf16.msra.mxu0 %v5125_v55  ;;  %v5217_v55 = vld [vmem:[%s5652_s23 + $0xd0] ss:$44 sps:$4 sm:$0xff]  }
  0x4b   : > { %1250 = vmatpush1.bf16.msra.mxu1 %v5128_v56  ;;  %1208 = vmatprep.subr.bf16.mxu0 %v5133_v57  ;;  %v5220_v56 = vld [vmem:[%s5652_s23 + $0xd8] ss:$44 sps:$4 sm:$0xff]   ;;  %v5223_v57 = vld [vmem:[%s5652_s23 + $0x7c] ss:$44 sps:$4 sm:$0xff]  }
  0x4c   : > { %1251 = vmatprep.subr.bf16.mxu1 %v5136_v58  ;;  %4445 = vmatprep.mubr.msk.bf16.mxu0 %vm1116_vm0, %v5634_v0  ;;  %v5221_v58 = vld [vmem:[%s5652_s23 + $0x78] ss:$44 sps:$4 sm:$0xff]  }
  0x4d   : > { %4446 = vmatprep.mubr.msk.bf16.mxu1 %vm1116_vm0, %v5634_v0 }
  0x4e   : > { %1209 = vmatpush1.bf16.msra.mxu0 %v5131_v59  ;;  %v5224_v59 = vld [vmem:[%s5652_s23 + $0x80] ss:$44 sps:$4 sm:$0xff]  }
  0x4f   : > { %1252 = vmatpush1.bf16.msra.mxu1 %v5134_v60  ;;  %1210 = vmatprep.subr.bf16.mxu0 %v5139_v61  ;;  %v5227_v60 = vld [vmem:[%s5652_s23 + $0x24] ss:$44 sps:$4 sm:$0xff]   ;;  %v5225_v61 = vld [vmem:[%s5652_s23 + $0x20] ss:$44 sps:$4 sm:$0xff]  }
  0x50   : > { %1253 = vmatprep.subr.bf16.mxu1 %v5142_v62  ;;  %v5228_v62 = vld [vmem:[%s5652_s23 + $0x28] ss:$44 sps:$4 sm:$0xff]  }
  0x52   : > { %1211 = vmatpush1.bf16.msra.mxu0 %v5137_v63  ;;  %v5231_v63 = vld [vmem:[%s5652_s23 + $0x3ec] ss:$44 sps:$4 sm:$0xff]  }
  0x53   : > { %1254 = vmatpush1.bf16.msra.mxu1 %v5140_v1  ;;  %1212 = vmatprep.subr.bf16.mxu0 %v5145_v3  ;;  %v5229_v1 = vld [vmem:[%s5652_s23 + $0x3e8] ss:$44 sps:$4 sm:$0xff]   ;;  %v5232_v3 = vld [vmem:[%s5652_s23 + $0x3f0] ss:$44 sps:$4 sm:$0xff]  }
  0x54   : > { %1255 = vmatprep.subr.bf16.mxu1 %v5148_v4  ;;  %v5235_v4 = vld [vmem:[%s5652_s23 + $0x394] ss:$44 sps:$4 sm:$0xff]  }
  0x56   : > { %1213 = vmatpush1.bf16.msra.mxu0 %v5143_v5  ;;  %v5233_v5 = vld [vmem:[%s5652_s23 + $0x390] ss:$44 sps:$4 sm:$0xff]  }
  0x57   : > { %1256 = vmatpush1.bf16.msra.mxu1 %v5146_v6  ;;  %1214 = vmatprep.subr.bf16.mxu0 %v5151_v7  ;;  %v5236_v6 = vld [vmem:[%s5652_s23 + $0x398] ss:$44 sps:$4 sm:$0xff]   ;;  %v5239_v7 = vld [vmem:[%s5652_s23 + $0x33c] ss:$44 sps:$4 sm:$0xff]  }
  0x58   : > { %1257 = vmatprep.subr.bf16.mxu1 %v5154_v8  ;;  %v5237_v8 = vld [vmem:[%s5652_s23 + $0x338] ss:$44 sps:$4 sm:$0xff]  }
  0x5a   : > { %1215 = vmatpush1.bf16.msra.mxu0 %v5149_v9  ;;  %v5240_v9 = vld [vmem:[%s5652_s23 + $0x340] ss:$44 sps:$4 sm:$0xff]  }
  0x5b   : > { %1258 = vmatpush1.bf16.msra.mxu1 %v5152_v10  ;;  %1216 = vmatprep.subr.bf16.mxu0 %v5157_v11  ;;  %v5243_v10 = vld [vmem:[%s5652_s23 + $0x2e4] ss:$44 sps:$4 sm:$0xff]   ;;  %v5241_v11 = vld [vmem:[%s5652_s23 + $0x2e0] ss:$44 sps:$4 sm:$0xff]  }
  0x5c   : > { %1259 = vmatprep.subr.bf16.mxu1 %v5160_v12  ;;  %v5244_v12 = vld [vmem:[%s5652_s23 + $0x2e8] ss:$44 sps:$4 sm:$0xff]  }
  0x5e   : > { %1217 = vmatpush1.bf16.msra.mxu0 %v5155_v13 }
  0x5f   : > { %1260 = vmatpush1.bf16.msra.mxu1 %v5158_v14  ;;  %1218 = vmatprep.subr.bf16.mxu0 %v5163_v15 }
  0x60   : > { %1261 = vmatprep.subr.bf16.mxu1 %v5166_v16 }
  0x62   : > { %1219 = vmatpush1.bf16.msra.mxu0 %v5161_v17 }
  0x63   : > { %1262 = vmatpush1.bf16.msra.mxu1 %v5164_v18  ;;  %1220 = vmatprep.subr.bf16.mxu0 %v5169_v19 }
  0x64   : > { %1263 = vmatprep.subr.bf16.mxu1 %v5172_v20 }
  0x66   : > { %1221 = vmatpush1.bf16.msra.mxu0 %v5167_v21 }
  0x67   : > { %1264 = vmatpush1.bf16.msra.mxu1 %v5170_v22  ;;  %1230 = vmatprep.subr.bf16.mxu0 %v5175_v23 }
  0x68   : > { %1273 = vmatprep.subr.bf16.mxu1 %v5178_v24 }
  0x6a   : > { %1231 = vmatpush2.bf16.msra.mxu0 %v5173_v25 }
  0x6b   : > { %1274 = vmatpush2.bf16.msra.mxu1 %v5176_v26  ;;  %1232 = vmatprep.subr.bf16.mxu0 %v5181_v27 }
  0x6c   : > { %1275 = vmatprep.subr.bf16.mxu1 %v5184_v28 }
  0x6e   : > { %1233 = vmatpush2.bf16.msra.mxu0 %v5179_v29 }
  0x6f   : > { %1276 = vmatpush2.bf16.msra.mxu1 %v5182_v30  ;;  %1234 = vmatprep.subr.bf16.mxu0 %v5187_v31 }
  0x70   : > { %1277 = vmatprep.subr.bf16.mxu1 %v5190_v32 }
  0x72   : > { %1235 = vmatpush2.bf16.msra.mxu0 %v5185_v33 }
  0x73   : > { %1278 = vmatpush2.bf16.msra.mxu1 %v5188_v34  ;;  %1236 = vmatprep.subr.bf16.mxu0 %v5193_v35 }
  0x74   : > { %1279 = vmatprep.subr.bf16.mxu1 %v5196_v36 }
  0x76   : > { %1237 = vmatpush2.bf16.msra.mxu0 %v5191_v37 }
  0x77   : > { %1280 = vmatpush2.bf16.msra.mxu1 %v5194_v38  ;;  %1292 = vmatprep.subr.bf16.mxu0 %v5199_v39 }
  0x78   : > { %1335 = vmatprep.subr.bf16.mxu1 %v5491_v2 }
  0x79   : > { %1239 = vmatmul.mubr.bf16.vlgmr.msra.gmra.mxu0 %v5707_v54 }
  0x7a   : > { %1282 = vmatmul.mubr.bf16.vlgmr.msra.gmra.mxu1 %v5707_v54  ;;  %1293 = vmatpush1.bf16.msra.mxu0 %v5197_v40 }
  0x7b   : > { %1336 = vmatpush1.bf16.msra.mxu1 %v5200_v41  ;;  %1294 = vmatprep.subr.bf16.mxu0 %v5203_v42 }
  0x7c   : > { %1337 = vmatprep.subr.bf16.mxu1 %v5491_v2  ;;  %4447 = vmatprep.mubr.msk.bf16.mxu0 %vm1116_vm0, %v5634_v0 }
  0x7d   : > { %4448 = vmatprep.mubr.msk.bf16.mxu1 %vm1116_vm0, %v5634_v0  ;;  %v5213_v0 = vld [vmem:[%s5652_s23 + $0x128] ss:$44 sps:$4 sm:$0xff]   ;;  %s5503_s23 = smov 94  }
  0x7e   : > { %1295 = vmatpush1.bf16.msra.mxu0 %v5201_v43 }
  0x7f   : > { %1338 = vmatpush1.bf16.msra.mxu1 %v5204_v44  ;;  %1296 = vmatprep.subr.bf16.mxu0 %v5207_v45 }
  0x80   : > { %1339 = vmatprep.subr.bf16.mxu1 %v5491_v2 }
  0x82   : > { %1297 = vmatpush1.bf16.msra.mxu0 %v5205_v46 }
  0x83   : > { %1340 = vmatpush1.bf16.msra.mxu1 %v5208_v47  ;;  %1298 = vmatprep.subr.bf16.mxu0 %v5211_v48 }
  0x84   : > { %1341 = vmatprep.subr.bf16.mxu1 %v5491_v2 }
  0x86   : > { %1299 = vmatpush1.bf16.msra.mxu0 %v5209_v49 }
  0x87   : > { %1342 = vmatpush1.bf16.msra.mxu1 %v5212_v50  ;;  %1300 = vmatprep.subr.bf16.mxu0 %v5215_v51 }
  0x88   : > { %1343 = vmatprep.subr.bf16.mxu1 %v5491_v2 }
  0x8a   : > { %1301 = vmatpush1.bf16.msra.mxu0 %v5213_v0 }
  0x8b   : > { %1344 = vmatpush1.bf16.msra.mxu1 %v5216_v52  ;;  %1302 = vmatprep.subr.bf16.mxu0 %v5219_v53 }
  0x8c   : > { %1345 = vmatprep.subr.bf16.mxu1 %v5491_v2 }
  0x8e   : > { %1303 = vmatpush1.bf16.msra.mxu0 %v5217_v55 }
  0x8f   : > { %1346 = vmatpush1.bf16.msra.mxu1 %v5220_v56  ;;  %1304 = vmatprep.subr.bf16.mxu0 %v5223_v57 }
  0x90   : > { %1347 = vmatprep.subr.bf16.mxu1 %v5491_v2 }
  0x91   : > { %v5817_v13 = vpop.permute.xlu0 %427 }
  0x92   : > { %1305 = vmatpush1.bf16.msra.mxu0 %v5221_v58 }
  0x93   : > { %1348 = vmatpush1.bf16.msra.mxu1 %v5224_v59  ;;  %1306 = vmatprep.subr.bf16.mxu0 %v5227_v60 }
  0x94   : > { %1349 = vmatprep.subr.bf16.mxu1 %v5491_v2 }
  0x95   : > { %v5821_v18 = vpop.permute.xlu0 %432 }
  0x96   : > { %1307 = vmatpush1.bf16.msra.mxu0 %v5225_v61 }
  0x97   : > { %1350 = vmatpush1.bf16.msra.mxu1 %v5228_v62  ;;  %1316 = vmatprep.subr.bf16.mxu0 %v5231_v63 }
  0x98   : > { %1359 = vmatprep.subr.bf16.mxu1 %v5491_v2 }
  0x9a   : > { %1317 = vmatpush2.bf16.msra.mxu0 %v5229_v1 }
  0x9b   : > { %1360 = vmatpush2.bf16.msra.mxu1 %v5232_v3  ;;  %1318 = vmatprep.subr.bf16.mxu0 %v5235_v4 }
  0x9c   : > { %1361 = vmatprep.subr.bf16.mxu1 %v5491_v2 }
  0x9e   : > { %1319 = vmatpush2.bf16.msra.mxu0 %v5233_v5 }
  0x9f   : > { %1362 = vmatpush2.bf16.msra.mxu1 %v5236_v6  ;;  %1320 = vmatprep.subr.bf16.mxu0 %v5239_v7 }
  0xa0   : > { %1363 = vmatprep.subr.bf16.mxu1 %v5491_v2 }
  0xa2   : > { %1321 = vmatpush2.bf16.msra.mxu0 %v5237_v8 }
  0xa3   : > { %1364 = vmatpush2.bf16.msra.mxu1 %v5240_v9  ;;  %1322 = vmatprep.subr.bf16.mxu0 %v5243_v10 }
  0xa4   : > { %1365 = vmatprep.subr.bf16.mxu1 %v5491_v2 }
  0xa6   : > { %1323 = vmatpush2.bf16.msra.mxu0 %v5241_v11 }
  0xa7   : > { %1366 = vmatpush2.bf16.msra.mxu1 %v5244_v12 }
  0xa9   : > { %1325 = vmatmul.mubr.bf16.vlgmr.msra.gmra.mxu0 %v5707_v54 }
  0xaa   : > { %1368 = vmatmul.mubr.bf16.vlgmr.msra.gmra.mxu1 %v5707_v54 }
 0x109   : > { %v1154_v14 = vpop.f32.mrf.mxu0 }
 0x10a   : > { %v1197_v15 = vpop.f32.mrf.mxu1  ;;  %v1155_v16 = vadd.f32 %v1154_v14, %v5817_v13 }
 0x10b   : > { %v1198_v17 = vadd.f32 %v1197_v15, %v5817_v13  ;;  %v1156_v19 = vpop.f32.mrf.mxu0 }
 0x10c   : > { %v1199_v20 = vpop.f32.mrf.mxu1  ;;  %v5823_v21 = vmax.f32 %v1155_v16, 0.0  ;;  %v1157_v2 = vadd.f32 %v1156_v19, %v5817_v13 }
 0x10d   : > { %v1200_v22 = vadd.f32 %v1199_v20, %v5817_v13  ;;  %v1378_v54 = vmax.f32 %v1198_v17, 0.0  ;;  %v1158_v23 = vpop.f32.mrf.mxu0 }
 0x10e   : > { %v1201_v24 = vpop.f32.mrf.mxu1  ;;  %v4667_v25 = vpack.c.bf16 %v5823_v21, %v5823_v21  ;;  %v5829_v26 = vmax.f32 %v1157_v2, 0.0  ;;  %v1159_v28 = vadd.f32 %v1158_v23, %v5821_v18 }
 0x10f   : > { %v1379_v27 = vmax.f32 %v1200_v22, 0.0  ;;  %v1202_v29 = vadd.f32 %v1201_v24, %v5821_v18  ;;  %v1160_v30 = vpop.f32.mrf.mxu0 }
 0x110   : > { %v1203_v31 = vpop.f32.mrf.mxu1  ;;  %1417 = vst.msk [vmem:[#allocation2] sm:$0xf] %vm1416_vm1, %v4667_v25  ;;  %v5834_v32 = vmax.f32 %v1159_v28, 0.0  ;;  %v1161_v33 = vadd.f32 %v1160_v30, %v5821_v18  ;;  %v5839_v37 = vpack.c.bf16 %v1378_v54, %v5829_v26  ;;  %v4669_v41 = vpack.c.bf16 %v5829_v26, %v5823_v21  ;;  %v1687_v21 = vld [vmem:[%s7104_s4 + $0x10] sm:$0xff] }
 0x111   : > { %v1204_v34 = vadd.f32 %v1203_v31, %v5821_v18  ;;  %v4677_v35 = vpack.c.bf16 %v1379_v27, %v1379_v27  ;;  %v1389_v36 = vmax.f32 %v1202_v29, 0.0  ;;  %v4675_v43 = vpack.c.bf16 %v1379_v27, %v1378_v54 }
 0x112   : > { %v4668_v38 = vpack.c.bf16 %v5834_v32, %v5834_v32  ;;  %v5843_v39 = vmax.f32 %v1161_v33, 0.0 }
 0x113   : > { %v1390_v40 = vmax.f32 %v1204_v34, 0.0  ;;  %1485 = vrot.lane.b32.xlu0 %v4677_v35, %s5492_s9 }
 0x114   : > { %1418 = vst.msk [vmem:[#allocation2 + $0x4] sm:$0xf] %vm1416_vm1, %v4668_v38  ;;  %v5849_v44 = vpack.c.bf16 %v1389_v36, %v5843_v39  ;;  %v4670_v45 = vpack.c.bf16 %v5843_v39, %v5834_v32  ;;  %v1686_v32 = vld [vmem:[%s7104_s4 + $0x8] sm:$0xff] }
 0x115   : > { %v4678_v42 = vpack.c.bf16 %v1390_v40, %v1390_v40  ;;  %v4676_v46 = vpack.c.bf16 %v1390_v40, %v1389_v36 }
 0x117   : > { %1487 = vrot.lane.b32.xlu1 %v4678_v42, %s5492_s9  ;;  %1470 = vrot.lane.b32.xlu0 %v4675_v43, %s5493_s13  ;;  %s5506_s9 = smov 120  }
 0x11b   : > { %1472 = vrot.lane.b32.xlu1 %v4676_v46, %s5493_s13  ;;  %s5510_s13 = smov 102  }
 0x139   : > { %v1240_v47 = vpop.f32.mrf.mxu0 }
 0x13a   : > { %v1241_v48 = vadd.f32 %v1240_v47, %v5817_v13  ;;  %v1283_v63 = vpop.f32.mrf.mxu1 }
 0x13b   : > { %v1242_v49 = vpop.f32.mrf.mxu0 }
 0x13c   : > { %v1380_v50 = vmax.f32 %v1241_v48, 0.0  ;;  %v1243_v51 = vadd.f32 %v1242_v49, %v5817_v13  ;;  %v1285_v1 = vpop.f32.mrf.mxu1 }
 0x13d   : > { %v1244_v0 = vpop.f32.mrf.mxu0  ;;  %v1286_v11 = vadd.f32 %v1285_v1, %v5817_v13  ;;  %v1685_v1 = vld [vmem:[%s7104_s4] sm:$0xff] }
 0x13e   : > { %v4679_v52 = vpack.c.bf16 %v1380_v50, %v1379_v27  ;;  %v5855_v53 = vmax.f32 %v1243_v51, 0.0  ;;  %v1245_v55 = vadd.f32 %v1244_v0, %v5821_v18  ;;  %v1287_v3 = vpop.f32.mrf.mxu1  ;;  %v1284_v27 = vadd.f32 %v1283_v63, %v5817_v13 }
 0x13f   : > { %v1246_v56 = vpop.f32.mrf.mxu0  ;;  %v1383_v54 = vmax.f32 %v1286_v11, 0.0  ;;  %v1288_v46 = vadd.f32 %v1287_v3, %v5821_v18  ;;  %v4671_v0 = vpack.c.bf16 %v5829_v26, %v5829_v26 }
 0x140   : > { %v1391_v57 = vmax.f32 %v1245_v55, 0.0  ;;  %v1247_v58 = vadd.f32 %v1246_v56, %v5821_v18  ;;  %1498 = vrot.lane.b32.xlu0 %v4679_v52, %s5494_s14  ;;  %v4681_v61 = vpack.c.bf16 %v5855_v53, %v1380_v50  ;;  %v1289_v4 = vpop.f32.mrf.mxu1  ;;  %v1382_v33 = vmax.f32 %v1284_v27, 0.0 }
 0x141   : > { %v1290_v28 = vadd.f32 %v1289_v4, %v5821_v18  ;;  %v1393_v48 = vmax.f32 %v1288_v46, 0.0 }
 0x142   : > { %v4680_v59 = vpack.c.bf16 %v1391_v57, %v1390_v40  ;;  %v5859_v60 = vmax.f32 %v1247_v58, 0.0  ;;  %v4689_v40 = vpack.c.bf16 %v1383_v54, %v1382_v33  ;;  %v4687_v49 = vpack.c.bf16 %v1382_v33, %v1382_v33 }
 0x143   : > { %v1394_v34 = vmax.f32 %v1290_v28, 0.0  ;;  %v4685_v55 = vpack.c.bf16 %v1382_v33, %v5855_v53  ;;  %v4688_v58 = vpack.c.bf16 %v1393_v48, %v1393_v48 }
 0x144   : > { %1500 = vrot.lane.b32.xlu1 %v4680_v59, %s5494_s14  ;;  %1516 = vrot.lane.b32.xlu0 %v4681_v61, %s5495_s15  ;;  %v4682_v62 = vpack.c.bf16 %v5859_v60, %v1391_v57  ;;  %v4686_v63 = vpack.c.bf16 %v1393_v48, %v5859_v60  ;;  %v4684_v26 = vpack.c.bf16 %v5859_v60, %v5859_v60  ;;  %s5511_s14 = smov 34  }
 0x145   : > { %v4690_v50 = vpack.c.bf16 %v1394_v34, %v1393_v48 }
 0x148   : > { %1518 = vrot.lane.b32.xlu1 %v4682_v62, %s5495_s15  ;;  %v4683_v62 = vpack.c.bf16 %v5855_v53, %v5855_v53  ;;  %v5263_v53 = vld [vmem:[%s7103_s3 + $0x4] ss:$8 sps:$4 sm:$0xff]   ;;  %s5516_s15 = smov 76  }
 0x149   : > { %1857 = vmatprep.mubr.bf16.mxu0 %v5263_v53 }
 0x169   : > { %v1326_v5 = vpop.f32.mrf.mxu0 }
 0x16a   : > { %v1369_v6 = vpop.f32.mrf.mxu1  ;;  %v1327_v7 = vadd.f32 %v1326_v5, %v5817_v13 }
 0x16b   : > { %v1370_v8 = vadd.f32 %v1369_v6, %v5817_v13  ;;  %v1328_v9 = vpop.f32.mrf.mxu0 }
 0x16c   : > { %v1371_v10 = vpop.f32.mrf.mxu1  ;;  %v1384_v12 = vmax.f32 %v1327_v7, 0.0  ;;  %v1329_v14 = vadd.f32 %v1328_v9, %v5817_v13 }
 0x16d   : > { %v1330_v15 = vpop.f32.mrf.mxu0  ;;  %v1386_v17 = vmax.f32 %v1370_v8, 0.0 }
 0x16e   : > { %v1372_v16 = vpop.f32.mrf.mxu1  ;;  %v1385_v19 = vmax.f32 %v1329_v14, 0.0  ;;  %v1331_v20 = vadd.f32 %v1330_v15, %v5821_v18  ;;  %v4693_v2 = vpack.c.bf16 %v1384_v12, %v1384_v12  ;;  %v4691_v29 = vpack.c.bf16 %v1384_v12, %v1383_v54 }
 0x16f   : > { %v1332_v25 = vpop.f32.mrf.mxu0  ;;  %v1373_v36 = vadd.f32 %v1372_v16, %v5821_v18 }
 0x170   : > { %v1374_v22 = vpop.f32.mrf.mxu1  ;;  %v4697_v23 = vpack.c.bf16 %v1386_v17, %v1385_v19  ;;  %v1395_v24 = vmax.f32 %v1331_v20, 0.0  ;;  %1605 = vrot.lane.b32.xlu0 %v4693_v2, %s5496_s16  ;;  %v1333_v30 = vadd.f32 %v1332_v25, %v5821_v18  ;;  %v4695_v35 = vpack.c.bf16 %v1385_v19, %v1384_v12 }
 0x171   : > { %v1397_v42 = vmax.f32 %v1373_v36, 0.0 }
 0x172   : > { %1636 = vrot.lane.b32.xlu1 %v4697_v23, %s5497_s17  ;;  %v4694_v31 = vpack.c.bf16 %v1395_v24, %v1395_v24  ;;  %v1396_v38 = vmax.f32 %v1333_v30, 0.0  ;;  %v4692_v13 = vpack.c.bf16 %v1395_v24, %v1394_v34 }
 0x174   : > { %1590 = vrot.lane.b32.xlu0 %v4691_v29, %s5498_s18  ;;  %v4698_v43 = vpack.c.bf16 %v1397_v42, %v1396_v38  ;;  %v4696_v47 = vpack.c.bf16 %v1396_v38, %v1395_v24 }
 0x176   : > { %1607 = vrot.lane.b32.xlu1 %v4694_v31, %s5496_s16  ;;  %s5517_s16 = smov 89  }
 0x178   : > { %1618 = vrot.lane.b32.xlu0 %v4695_v35, %s5499_s19 }
 0x17a   : > { %1592 = vrot.lane.b32.xlu1 %v4692_v13, %s5498_s18  ;;  %s5509_s18 = smov 81  }
 0x17c   : > { %1572 = vrot.lane.b32.xlu0 %v4689_v40, %s5500_s20 }
 0x17e   : > { %1638 = vrot.lane.b32.xlu1 %v4698_v43, %s5497_s17  ;;  %s5508_s17 = smov 68  }
 0x180   : > { %1452 = vrot.lane.b32.xlu0 %v5839_v37, %s5501_s21 }
 0x182   : > { %1620 = vrot.lane.b32.xlu1 %v4696_v47, %s5499_s19  ;;  %s5514_s19 = smov 8  }
 0x184   : > { %1559 = vrot.lane.b32.xlu0 %v4687_v49, %s5502_s22 }
 0x185   : > { %v1486_v51 = vpop.permute.xlu0 %1485 }
 0x186   : > { %1491 = vst.msk [vmem:[#allocation2 + $0x28] sm:$0xf] %vm1416_vm1, %v1486_v51  ;;  %1574 = vrot.lane.b32.xlu1 %v4690_v50, %s5500_s20  ;;  %s5515_s20 = smov 55  }
 0x188   : > { %1439 = vrot.lane.b32.xlu0 %v4671_v0, %s5503_s23 }
 0x189   : > { %v1488_v52 = vpop.permute.xlu1 %1487  ;;  %v1471_v18 = vpop.permute.xlu0 %1470 }
 0x18a   : > { %1492 = vst.msk [vmem:[#allocation2 + $0x2c] sm:$0xf] %vm1416_vm1, %v1488_v52  ;;  %v1474_v37 = vrot.slane %v1471_v18, 4  ;;  %1454 = vrot.lane.b32.xlu1 %v5849_v44, %s5501_s21  ;;  %v4672_v44 = vpack.c.bf16 %v5843_v39, %v5843_v39  ;;  %s5520_s21 = smov 29  }
 0x18c   : > { %v1477_v56 = vsel %vm1476_vm2, %v1471_v18, %v1474_v37  ;;  %1544 = vrot.lane.b32.xlu0 %v4685_v55, %s5504_s29 }
 0x18d   : > { %1481 = vst.msk [vmem:[#allocation2 + $0x20] sm:$0xf] %vm1416_vm1, %v1477_v56  ;;  %v1473_v57 = vpop.permute.xlu1 %1472 }
 0x18e   : > { %v1475_v59 = vrot.slane %v1473_v57, 4  ;;  %1561 = vrot.lane.b32.xlu1 %v4688_v58, %s5502_s22  ;;  %s5521_s22 = smov 42  }
 0x190   : > { %v1478_v61 = vsel %vm1476_vm2, %v1473_v57, %v1475_v59  ;;  %1424 = vrot.lane.b32.xlu0 %v4669_v41, %s5505_s8  ;;  %v1688_v41 = vld [vmem:[%s7104_s4 + $0x18] sm:$0xff] }
 0x191   : > { %1482 = vst.msk [vmem:[#allocation2 + $0x24] sm:$0xf] %vm1416_vm1, %v1478_v61 }
 0x192   : > { %1441 = vrot.lane.b32.xlu1 %v4672_v44, %s5503_s23  ;;  %s5512_s23 = smov 21  }
 0x194   : > { %1531 = vrot.lane.b32.xlu0 %v4683_v62, %s5506_s9 }
 0x196   : > { %1546 = vrot.lane.b32.xlu1 %v4686_v63, %s5504_s29  ;;  %s5513_s29 = smov 115  }
 0x198   : > { %1691 = vperm.xlu0 %5048, %v1685_v1   ;;  %v5250_v1 = vld [vmem:[#allocation2 + $0x28] sm:$0xff]  }
 0x19a   : > { %1426 = vrot.lane.b32.xlu1 %v4670_v45, %s5505_s8  ;;  %s5518_s8 = smov 110  }
 0x19c   : > { %1701 = vperm.xlu0 %5048, %v1687_v21  }
 0x19e   : > { %1533 = vrot.lane.b32.xlu1 %v4684_v26, %s5506_s9  ;;  %s5519_s9 = smov 123  }
 0x1a0   : > { %1706 = vperm.xlu0 %5048, %v1688_v41  }
 0x1a2   : > { %1696 = vperm.xlu1 %5049, %v1686_v32   ;;  %v5252_v32 = vld [vmem:[#allocation2 + $0x20] sm:$0xff]  }
 0x1b2   : > { %v1499_v39 = vpop.permute.xlu0 %1498 }
 0x1b3   : > { %v1502_v45 = vrot.slane %v1499_v39, 4 }
 0x1b5   : > { %v1505_v60 = vsel %vm1504_vm3, %v1499_v39, %v1502_v45 }
 0x1b6   : > { %1509 = vst.msk [vmem:[#allocation2 + $0x30] sm:$0xf] %vm1416_vm1, %v1505_v60  ;;  %v1501_v3 = vpop.permute.xlu1 %1500  ;;  %v1517_v4 = vpop.permute.xlu0 %1516 }
 0x1b7   : > { %v1503_v5 = vrot.slane %v1501_v3, 4  ;;  %v1520_v6 = vrot.slane %v1517_v4, 4 }
 0x1b9   : > { %v1506_v7 = vsel %vm1504_vm3, %v1501_v3, %v1503_v5  ;;  %v1523_v8 = vsel %vm1522_vm4, %v1517_v4, %v1520_v6 }
 0x1ba   : > { %1510 = vst.msk [vmem:[#allocation2 + $0x34] sm:$0xf] %vm1416_vm1, %v1506_v7  ;;  %1527 = vst.msk [vmem:[#allocation2 + $0x38] sm:$0xf] %vm1416_vm1, %v1523_v8  ;;  %v1519_v9 = vpop.permute.xlu1 %1518 }
 0x1bb   : > { %v1521_v10 = vrot.slane %v1519_v9, 4 }
 0x1bd   : > { %v1524_v11 = vsel %vm1522_vm4, %v1519_v9, %v1521_v10 }
 0x1be   : > { %1528 = vst.msk [vmem:[#allocation2 + $0x3c] sm:$0xf] %vm1416_vm1, %v1524_v11 }
 0x1c1   : > { %v5248_v58 = vld [vmem:[#allocation2 + $0x30] sm:$0xff]  }
 0x1c5   : > { %v5246_v0 = vld [vmem:[#allocation2 + $0x38] sm:$0xff]  }
 0x1e2   : > { %v1606_v12 = vpop.permute.xlu0 %1605 }
 0x1e3   : > { %1611 = vst.msk [vmem:[#allocation2 + $0x68] sm:$0xf] %vm1416_vm1, %v1606_v12 }
 0x1e4   : > { %v1637_v14 = vpop.permute.xlu1 %1636 }
 0x1e5   : > { %v1640_v15 = vrot.slane %v1637_v14, 4 }
 0x1e6   : > { %v1591_v16 = vpop.permute.xlu0 %1590 }
 0x1e7   : > { %v1643_v17 = vsel %vm1642_vm5, %v1637_v14, %v1640_v15  ;;  %v1594_v19 = vrot.slane %v1591_v16, 4  ;;  %v5260_v14 = vld [vmem:[#allocation2] sm:$0xff]  }
 0x1e8   : > { %1647 = vst.msk [vmem:[#allocation2 + $0x78] sm:$0xf] %vm1416_vm1, %v1643_v17  ;;  %v1608_v20 = vpop.permute.xlu1 %1607  ;;  %v5261_v15 = vld [vmem:[%s7103_s3] ss:$8 sps:$4 sm:$0xff]   ;;  %v5266_v17 = vld [vmem:[%s7103_s3 + $0x10] ss:$8 sps:$4 sm:$0xff]  }
 0x1e9   : > { %v1597_v2 = vsel %vm1596_vm6, %v1591_v16, %v1594_v19  ;;  %1612 = vst.msk [vmem:[#allocation2 + $0x6c] sm:$0xf] %vm1416_vm1, %v1608_v20  ;;  %v5264_v16 = vld [vmem:[%s7103_s3 + $0x14] ss:$8 sps:$4 sm:$0xff]   ;;  %v1878_v19 = vlaneseq  ;;  %v5507_v20 = vmov 1966171168  }
 0x1ea   : > { %1601 = vst.msk [vmem:[#allocation2 + $0x60] sm:$0xf] %vm1416_vm1, %v1597_v2  ;;  %v1619_v22 = vpop.permute.xlu0 %1618  ;;  %v1885_v2 = vunpack.c.l.s4 %v5507_v20 }
 0x1eb   : > { %v1622_v54 = vrot.slane %v1619_v22, 4  ;;  %vm1880_vm12 = vcmp.lt.s32.totalorder %v1878_v19, 81  ;;  %vm1912_vm13 = vcmp.ge.s32.totalorder %v1878_v19, 81  ;;  %vm1913_vm14 = vcmp.lt.s32.totalorder %v1878_v19, 162 }
 0x1ec   : > { %v1593_v23 = vpop.permute.xlu1 %1592  ;;  %vm1920_vm15 = vcmp.ge.s32.totalorder %v1878_v19, 34  ;;  %vm1921_vm0 = vcmp.lt.s32.totalorder %v1878_v19, 115  ;;  %vm1914_vm2 = vmand %vm1912_vm13, %vm1913_vm14  ;;  %vm6099_vm4 = vcmp.ge.s32.totalorder %v1878_v19, 115  ;;  %vm6133_vm13 = vcmp.ge.s32.totalorder %v1878_v19, 102 }
 0x1ed   : > { %v1625_v24 = vsel %vm1624_vm7, %v1619_v22, %v1622_v54  ;;  %v1595_v25 = vrot.slane %v1593_v23, 4  ;;  %v1886_v54 = vunpack.c.0.s8 %v1885_v2  ;;  %v5289_v2 = vld [vmem:[%s7105_s5 + $0x10] sm:$0xff]   ;;  %vm1922_vm3 = vmand %vm1920_vm15, %vm1921_vm0  ;;  %vm6138_vm14 = vcmp.lt.s32.totalorder %v1878_v19, 183 }
 0x1ee   : > { %1629 = vst.msk [vmem:[#allocation2 + $0x70] sm:$0xf] %vm1416_vm1, %v1625_v24  ;;  %v1573_v27 = vpop.permute.xlu0 %1572  ;;  %vm6147_vm0 = vcmp.ge.s32.totalorder %v1878_v19, 55 }
 0x1ef   : > { %v1598_v28 = vsel %vm1596_vm6, %v1593_v23, %v1595_v25  ;;  %v1576_v29 = vrot.slane %v1573_v27, 4  ;;  %v5962_v23 = vshrl.u32 %v1878_v19, 7  ;;  %vm6109_vm6 = vcmp.ge.s32.totalorder %v1878_v19, 68 }
 0x1f0   : > { %1602 = vst.msk [vmem:[#allocation2 + $0x64] sm:$0xf] %vm1416_vm1, %v1598_v28  ;;  %v1639_v30 = vpop.permute.xlu1 %1638  ;;  %v5249_v61 = vld [vmem:[#allocation2 + $0x68] sm:$0xff]  }
 0x1f1   : > { %v1579_v31 = vsel %vm1578_vm8, %v1573_v27, %v1576_v29  ;;  %v1641_v33 = vrot.slane %v1639_v30, 4 }
 0x1f2   : > { %1583 = vst.msk [vmem:[#allocation2 + $0x58] sm:$0xf] %vm1416_vm1, %v1579_v31  ;;  %v1453_v34 = vpop.permute.xlu0 %1452 }
 0x1f3   : > { %v1644_v35 = vsel %vm1642_vm5, %v1639_v30, %v1641_v33  ;;  %v1456_v36 = vrot.slane %v1453_v34, 4  ;;  %v5965_v30 = vsub.s32 %v1886_v54, %v5962_v23  ;;  %vm6104_vm5 = vcmp.lt.s32.totalorder %v1878_v19, 196 }
 0x1f4   : > { %1648 = vst.msk [vmem:[#allocation2 + $0x7c] sm:$0xf] %vm1416_vm1, %v1644_v35  ;;  %v1621_v38 = vpop.permute.xlu1 %1620  ;;  %v5268_v35 = vld [vmem:[%s7105_s5 + $0xf8] sm:$0xff]  }
 0x1f5   : > { %v1459_v13 = vsel %vm1458_vm9, %v1453_v34, %v1456_v36  ;;  %v1623_v40 = vrot.slane %v1621_v38, 4  ;;  %v5267_v34 = vld [vmem:[%s7105_s5 + $0x78] sm:$0xff]  }
 0x1f6   : > { %1463 = vst.msk [vmem:[#allocation2 + $0x18] sm:$0xf] %vm1416_vm1, %v1459_v13  ;;  %v1560_v42 = vpop.permute.xlu0 %1559  ;;  %v5269_v36 = vld [vmem:[%s7105_s5 + $0x38] sm:$0xff]   ;;  %4727 = vmatprep.subr.bf16.mxu1 %v5267_v34 }
 0x1f7   : > { %v1626_v43 = vsel %vm1624_vm7, %v1621_v38, %v1623_v40  ;;  %1565 = vst.msk [vmem:[#allocation2 + $0x50] sm:$0xf] %vm1416_vm1, %v1560_v42  ;;  %v5251_v26 = vld [vmem:[#allocation2 + $0x60] sm:$0xff]   ;;  %v5270_v42 = vld [vmem:[%s7105_s5 + $0xb8] sm:$0xff]   ;;  %4728 = vmatpush3.bf16.msra.mxu1 %v5269_v36  ;;  %vm6114_vm7 = vcmp.lt.s32.totalorder %v1878_v19, 149 }
 0x1f8   : > { %1630 = vst.msk [vmem:[#allocation2 + $0x74] sm:$0xf] %vm1416_vm1, %v1626_v43  ;;  %v1575_v46 = vpop.permute.xlu1 %1574  ;;  %v5295_v36 = vld [vmem:[%s7105_s5 + $0x40] sm:$0xff]   ;;  %vm1958_vm15 = vmand %vm6109_vm6, %vm6114_vm7  ;;  %vm1990_vm7 = vcmask 449536  }
 0x1f9   : > { %v1577_v47 = vrot.slane %v1575_v46, 4  ;;  %vm1984_vm6 = vmand %vm6133_vm13, %vm6138_vm14  ;;  %vm6197_vm14 = vcmp.ge.s32.totalorder %v1878_v19, 42 }
 0x1fa   : > { %v1440_v48 = vpop.permute.xlu0 %1439 }
 0x1fb   : > { %v1580_v49 = vsel %vm1578_vm8, %v1575_v46, %v1577_v47  ;;  %1445 = vst.msk [vmem:[#allocation2 + $0x10] sm:$0xf] %vm1416_vm1, %v1440_v48  ;;  %v5245_v50 = vld [vmem:[#allocation2 + $0x78] sm:$0xff]   ;;  %v5271_v48 = vld [vmem:[%s7105_s5 + $0x70] sm:$0xff]   ;;  %vm1928_vm8 = vcmask 941056  }
 0x1fc   : > { %1584 = vst.msk [vmem:[#allocation2 + $0x5c] sm:$0xf] %vm1416_vm1, %v1580_v49  ;;  %v1455_v51 = vpop.permute.xlu1 %1454  ;;  %4699 = vmatprep.subr.bf16.mxu0 %v5245_v50  ;;  %v5272_v49 = vld [vmem:[%s7105_s5 + $0xf0] sm:$0xff]   ;;  %4729 = vmatprep.subr.bf16.mxu1 %v5271_v48 }
 0x1fd   : > { %v1457_v52 = vrot.slane %v1455_v51, 4  ;;  %4700 = vmatpush3.bf16.msra.mxu0 %v5246_v0  ;;  %v5273_v0 = vld [vmem:[%s7105_s5 + $0x30] sm:$0xff]  }
 0x1fe   : > { %v1545_v18 = vpop.permute.xlu0 %1544  ;;  %4730 = vmatpush3.bf16.msra.mxu1 %v5273_v0 }
 0x1ff   : > { %v1460_v37 = vsel %vm1458_vm9, %v1455_v51, %v1457_v52  ;;  %v1548_v55 = vrot.slane %v1545_v18, 4  ;;  %v5247_v56 = vld [vmem:[#allocation2 + $0x70] sm:$0xff]   ;;  %vm6119_vm9 = vcmp.ge.s32.totalorder %v1878_v19, 21 }
 0x200   : > { %1464 = vst.msk [vmem:[#allocation2 + $0x1c] sm:$0xf] %vm1416_vm1, %v1460_v37  ;;  %v1562_v57 = vpop.permute.xlu1 %1561  ;;  %4701 = vmatprep.subr.bf16.mxu0 %v5247_v56  ;;  %v5274_v52 = vld [vmem:[%s7105_s5 + $0xb0] sm:$0xff]   ;;  %v5275_v56 = vld [vmem:[%s7105_s5 + $0x68] sm:$0xff]  }
 0x201   : > { %v1551_v59 = vsel %vm1550_vm10, %v1545_v18, %v1548_v55  ;;  %1566 = vst.msk [vmem:[#allocation2 + $0x54] sm:$0xf] %vm1416_vm1, %v1562_v57  ;;  %4702 = vmatpush3.bf16.msra.mxu0 %v5248_v58  ;;  %v5276_v57 = vld [vmem:[%s7105_s5 + $0xe8] sm:$0xff]   ;;  %4731 = vmatprep.subr.bf16.mxu1 %v5275_v56 }
 0x202   : > { %1555 = vst.msk [vmem:[#allocation2 + $0x48] sm:$0xf] %vm1416_vm1, %v1551_v59  ;;  %v1425_v44 = vpop.permute.xlu0 %1424  ;;  %4703 = vmatprep.subr.bf16.mxu0 %v5249_v61 }
 0x203   : > { %v1428_v62 = vrot.slane %v1425_v44, 4  ;;  %v5253_v45 = vld [vmem:[#allocation2 + $0x58] sm:$0xff]  }
 0x204   : > { %v1442_v63 = vpop.permute.xlu1 %1441 }
 0x205   : > { %v1431_v21 = vsel %vm1430_vm11, %v1425_v44, %v1428_v62  ;;  %1446 = vst.msk [vmem:[#allocation2 + $0x14] sm:$0xf] %vm1416_vm1, %v1442_v63  ;;  %4704 = vmatpush3.bf16.msra.mxu0 %v5250_v1  ;;  %v5277_v44 = vld [vmem:[%s7105_s5 + $0x28] sm:$0xff]  }
 0x206   : > { %1435 = vst.msk [vmem:[#allocation2 + $0x8] sm:$0xf] %vm1416_vm1, %v1431_v21  ;;  %v1532_v41 = vpop.permute.xlu0 %1531  ;;  %4705 = vmatprep.subr.bf16.mxu0 %v5251_v26  ;;  %v5278_v62 = vld [vmem:[%s7105_s5 + $0xa8] sm:$0xff]   ;;  %4732 = vmatpush3.bf16.msra.mxu1 %v5277_v44  ;;  %v5279_v21 = vld [vmem:[%s7105_s5 + $0x60] sm:$0xff]  }
 0x207   : > { %1537 = vst.msk [vmem:[#allocation2 + $0x40] sm:$0xf] %vm1416_vm1, %v1532_v41  ;;  %v5254_v4 = vld [vmem:[#allocation2 + $0x18] sm:$0xff]   ;;  %v5280_v26 = vld [vmem:[%s7105_s5 + $0xe0] sm:$0xff]   ;;  %4733 = vmatprep.subr.bf16.mxu1 %v5279_v21 }
 0x208   : > { %v1547_v53 = vpop.permute.xlu1 %1546  ;;  %v5255_v6 = vld [vmem:[#allocation2 + $0x50] sm:$0xff]  }
 0x209   : > { %v1549_v39 = vrot.slane %v1547_v53, 4  ;;  %4706 = vmatpush3.bf16.msra.mxu0 %v5252_v32 }
 0x20a   : > { %4707 = vmatprep.subr.bf16.mxu0 %v5253_v45  ;;  %v5281_v45 = vld [vmem:[%s7105_s5 + $0x20] sm:$0xff]  }
 0x20b   : > { %v1552_v60 = vsel %vm1550_vm10, %v1547_v53, %v1549_v39  ;;  %4734 = vmatpush3.bf16.msra.mxu1 %v5281_v45  ;;  %vm6124_vm10 = vcmp.lt.s32.totalorder %v1878_v19, 102 }
 0x20c   : > { %1556 = vst.msk [vmem:[#allocation2 + $0x4c] sm:$0xf] %vm1416_vm1, %v1552_v60  ;;  %v1427_v3 = vpop.permute.xlu1 %1426  ;;  %v5256_v9 = vld [vmem:[#allocation2 + $0x10] sm:$0xff]   ;;  %v5282_v60 = vld [vmem:[%s7105_s5 + $0xa0] sm:$0xff]  }
 0x20d   : > { %v1429_v5 = vrot.slane %v1427_v3, 4  ;;  %4708 = vmatpush3.bf16.msra.mxu0 %v5254_v4 }
 0x20e   : > { %4709 = vmatprep.subr.bf16.mxu0 %v5255_v6  ;;  %v5284_v6 = vld [vmem:[%s7105_s5 + $0xd8] sm:$0xff]  }
 0x20f   : > { %v1432_v7 = vsel %vm1430_vm11, %v1427_v3, %v1429_v5  ;;  %v5283_v5 = vld [vmem:[%s7105_s5 + $0x58] sm:$0xff]   ;;  %vm1953_vm11 = vcmask 556032  }
 0x210   : > { %1436 = vst.msk [vmem:[#allocation2 + $0xc] sm:$0xf] %vm1416_vm1, %v1432_v7  ;;  %v1534_v8 = vpop.permute.xlu1 %1533  ;;  %4735 = vmatprep.subr.bf16.mxu1 %v5283_v5 }
 0x211   : > { %1538 = vst.msk [vmem:[#allocation2 + $0x44] sm:$0xf] %vm1416_vm1, %v1534_v8  ;;  %4710 = vmatpush3.bf16.msra.mxu0 %v5256_v9  ;;  %vm1909_vm1 = vcmask 662528  }
 0x213   : > { %v5257_v10 = vld [vmem:[#allocation2 + $0x48] sm:$0xff]   ;;  %v1692_v27 = vpop.permute.xlu0 %1691 }
 0x214   : > { %4711 = vmatprep.subr.bf16.mxu0 %v5257_v10  ;;  %v5285_v10 = vld [vmem:[%s7105_s5 + $0x18] sm:$0xff]  }
 0x215   : > { %4736 = vmatpush3.bf16.msra.mxu1 %v5285_v10 }
 0x217   : > { %v5258_v11 = vld [vmem:[#allocation2 + $0x8] sm:$0xff]   ;;  %v1702_v4 = vpop.permute.xlu0 %1701 }
 0x218   : > { %v5259_v12 = vld [vmem:[#allocation2 + $0x40] sm:$0xff]   ;;  %4712 = vmatpush3.bf16.msra.mxu0 %v5258_v11  ;;  %v5286_v11 = vld [vmem:[%s7105_s5 + $0x98] sm:$0xff]  }
 0x219   : > { %4713 = vmatprep.subr.bf16.mxu0 %v5259_v12 }
 0x21c   : > { %4714 = vmatpush3.bf16.msra.mxu0 %v5260_v14 }
 0x21d   : > { %v1697_v43 = vpop.permute.xlu1 %1696  ;;  %4749 = vmatprep.subr.bf16.mxu0 %v5268_v35 }
 0x21f   : > { %1858 = vmatmul.mubr.bf16.vlgmr.msra.gmra.mxu0 %v5261_v15  ;;  %v5287_v15 = vld [vmem:[%s7105_s5 + $0x50] sm:$0xff]  }
 0x220   : > { %1865 = vmatprep.mubr.bf16.mxu0 %v5264_v16  ;;  %4750 = vmatpush3.bf16.msra.mxu0 %v5270_v42  ;;  %v5288_v16 = vld [vmem:[%s7105_s5 + $0xd0] sm:$0xff]  }
 0x221   : > { %4751 = vmatprep.subr.bf16.mxu0 %v5272_v49  ;;  %4737 = vmatprep.subr.bf16.mxu1 %v5287_v15  ;;  %v5299_v49 = vld [vmem:[%s7105_s5 + $0x178] sm:$0xff]   ;;  %v2388_v15 = vsub.s32 5, %v5962_v23 }
 0x222   : > { %4738 = vmatpush3.bf16.msra.mxu1 %v5289_v2 }
 0x224   : > { %4752 = vmatpush3.bf16.msra.mxu0 %v5274_v52 }
 0x225   : > { %4753 = vmatprep.subr.bf16.mxu0 %v5276_v57 }
 0x227   : > { %1866 = vmatmul.mubr.bf16.gmra.mxu0 %v5266_v17 }
 0x228   : > { %4754 = vmatpush3.bf16.msra.mxu0 %v5278_v62 }
 0x229   : > { %4755 = vmatprep.subr.bf16.mxu0 %v5280_v26 }
 0x22c   : > { %4756 = vmatpush3.bf16.msra.mxu0 %v5282_v60 }
 0x22d   : > { %4757 = vmatprep.subr.bf16.mxu0 %v5284_v6 }
 0x230   : > { %4758 = vmatpush3.bf16.msra.mxu0 %v5286_v11 }
 0x231   : > { %4759 = vmatprep.subr.bf16.mxu0 %v5288_v16 }
 0x2df   : > { %v4715_v22 = vpop.f32.mrf.mxu0 }
 0x2e1   : > { %v4716_v24 = vpop.f32.mrf.mxu0 }
 0x2e2   : > { %v4717_v25 = vadd.f32 %v4716_v24, %v4715_v22  ;;  %v5290_v22 = vld [vmem:[%s7105_s5 + $0x90] sm:$0xff]   ;;  %v5291_v24 = vld [vmem:[%s7105_s5 + $0x48] sm:$0xff]  }
 0x2e3   : > { %v4718_v28 = vpop.f32.mrf.mxu0  ;;  %4760 = vmatpush3.bf16.msra.mxu0 %v5290_v22  ;;  %4739 = vmatprep.subr.bf16.mxu1 %v5291_v24 }
 0x2e4   : > { %v1860_v29 = vadd.f32 %v4717_v25, %v1692_v27  ;;  %v5292_v25 = vld [vmem:[%s7105_s5 + $0xc8] sm:$0xff]  }
 0x2e5   : > { %v4719_v31 = vpop.f32.mrf.mxu0  ;;  %4761 = vmatprep.subr.bf16.mxu0 %v5292_v25 }
 0x2e6   : > { %v1874_v33 = vmax.f32 %v1860_v29, 0.0  ;;  %v4720_v40 = vadd.f32 %v4719_v31, %v4718_v28  ;;  %v5293_v31 = vld [vmem:[%s7105_s5 + $0x8] sm:$0xff]  }
 0x2e7   : > { %v4721_v18 = vpop.f32.mrf.mxu0  ;;  %4740 = vmatpush3.bf16.msra.mxu1 %v5293_v31 }
 0x2e8   : > { %v1890_v38 = vrot.slane %v1874_v33, %v5965_v30  ;;  %v1935_v13 = vcombine.high %v1874_v33, %v1874_v33  ;;  %1882 = vst.msk [vmem:[#allocation3] sm:$0x1] %vm1880_vm12, %v1874_v33  ;;  %v1863_v50 = vadd.f32 %v4720_v40, %v1697_v43  ;;  %v5294_v33 = vld [vmem:[%s7105_s5 + $0x88] sm:$0xff]   ;;  %v5297_v43 = vld [vmem:[%s7105_s5] sm:$0xff]   ;;  %4741 = vmatprep.subr.bf16.mxu1 %v5295_v36  ;;  %vm1933_vm12 = vmand %vm6099_vm4, %vm6104_vm5  ;;  %vm6161_vm4 = vcmp.ge.s32.totalorder %v1878_v19, 8 }
 0x2e9   : > { %v4722_v63 = vpop.f32.mrf.mxu0  ;;  %4762 = vmatpush3.bf16.msra.mxu0 %v5294_v33  ;;  %vm6166_vm5 = vcmp.lt.s32.totalorder %v1878_v19, 89 }
 0x2ea   : > { %v1942_v46 = vrot.slane %v1935_v13, %v5965_v30  ;;  %v1891_v47 = vcombine.high %v1890_v38, %v1890_v38  ;;  %v1898_v55 = vrot.slane %v1890_v38, %v5965_v30  ;;  %v1875_v58 = vmax.f32 %v1863_v50, 0.0  ;;  %v5296_v38 = vld [vmem:[%s7105_s5 + $0xc0] sm:$0xff]   ;;  %v5300_v50 = vld [vmem:[%s7105_s5 + $0x1f8] sm:$0xff]  }
 0x2eb   : > { %v4723_v32 = vadd.f32 %v4722_v63, %v4721_v18  ;;  %v4724_v34 = vpop.f32.mrf.mxu0  ;;  %4763 = vmatprep.subr.bf16.mxu0 %v5296_v38  ;;  %4742 = vmatpush3.bf16.msra.mxu1 %v5297_v43  ;;  %v1707_v18 = vpop.permute.xlu0 %1706 }
 0x2ec   : > { %v1949_v51 = vrot.slane %v1942_v46, %v5965_v30  ;;  %v1905_v37 = vrot.slane %v1891_v47, %v5965_v30  ;;  %v1960_v61 = vcombine.high %v1942_v46, %v1942_v46  ;;  %v1916_v1 = vcombine.high %v1898_v55, %v1898_v55  ;;  %v5298_v46 = vld [vmem:[%s7105_s5 + $0x80] sm:$0xff]   ;;  %4771 = vmatprep.subr.bf16.mxu1 %v5299_v49 }
 0x2ed   : > { %v2004_v41 = vrot.slane %v1875_v58, %v5965_v30  ;;  %v2056_v53 = vcombine.high %v1875_v58, %v1875_v58  ;;  %v1868_v8 = vadd.f32 %v4723_v32, %v1702_v4  ;;  %v4725_v47 = vpop.f32.mrf.mxu0  ;;  %4764 = vmatpush3.bf16.msra.mxu0 %v5298_v46 }
 0x2ee   : > { %1950 = vrot.lane.b32.xlu0 %v1949_v51, %s5508_s17  ;;  %1906 = vrot.lane.b32.xlu1 %v1905_v37, %s5509_s18  ;;  %v1975_v59 = vcombine.high %v1949_v51, %v1949_v51  ;;  %v1967_v39 = vrot.slane %v1960_v61, %v5965_v30  ;;  %v1924_v3 = vcombine.high %v1905_v37, %v1905_v37  ;;  %s5526_s17 = smov 118   ;;  %s5527_s18 = smov 97  }
 0x2ef   : > { %v2063_v7 = vrot.slane %v2056_v53, %v5965_v30  ;;  %v2011_v9 = vrot.slane %v2004_v41, %v5965_v30  ;;  %v2019_v12 = vcombine.high %v2004_v41, %v2004_v41  ;;  %v1876_v17 = vmax.f32 %v1868_v8, 0.0  ;;  %4793 = vmatprep.subr.bf16.mxu0 %v5300_v50 }
 0x2f0   : > { %v1986_v14 = vcombine.high %v1967_v39, %v1967_v39  ;;  %v4726_v51 = vadd.f32 %v4725_v47, %v4724_v34 }
 0x2f1   : > { %v2070_v20 = vrot.slane %v2063_v7, %v5965_v30  ;;  %v2026_v54 = vrot.slane %v2019_v12, %v5965_v30  ;;  %v2125_v27 = vrot.slane %v1876_v17, %v5965_v30  ;;  %v2081_v29 = vcombine.high %v2063_v7, %v2063_v7 }
 0x2f2   : > { %1976 = vrot.lane.b32.xlu0 %v1975_v59, %s5510_s13  ;;  %1917 = vrot.lane.b32.xlu1 %v1916_v1, %s5511_s14  ;;  %v2177_v13 = vcombine.high %v1876_v17, %v1876_v17  ;;  %v2037_v48 = vcombine.high %v2011_v9, %v2011_v9  ;;  %s5522_s13 = smov 50   ;;  %s5523_s14 = smov 16   ;;  %v1871_v37 = vadd.f32 %v4726_v51, %v1707_v18 }
 0x2f3   : > { %v2096_v28 = vcombine.high %v2070_v20, %v2070_v20  ;;  %v2045_v35 = vcombine.high %v2026_v54, %v2026_v54  ;;  %v2088_v40 = vrot.slane %v2081_v29, %v5965_v30  ;;  %v2132_v42 = vrot.slane %v2125_v27, %v5965_v30 }
 0x2f4   : > { %v2184_v52 = vrot.slane %v2177_v13, %v5965_v30  ;;  %v2140_v57 = vcombine.high %v2125_v27, %v2125_v27  ;;  %v1877_v58 = vmax.f32 %v1871_v37, 0.0 }
 0x2f5   : > { %v2158_v0 = vcombine.high %v2132_v42, %v2132_v42  ;;  %v2107_v56 = vcombine.high %v2088_v40, %v2088_v40 }
 0x2f6   : > { %1968 = vrot.lane.b32.xlu0 %v1967_v39, %s5512_s23  ;;  %1925 = vrot.lane.b32.xlu1 %v1924_v3, %s5513_s29  ;;  %v2191_v55 = vrot.slane %v2184_v52, %v5965_v30  ;;  %v2202_v61 = vcombine.high %v2184_v52, %v2184_v52  ;;  %v2147_v44 = vrot.slane %v2140_v57, %v5965_v30  ;;  %s5532_s23 = smov 92   ;;  %s5533_s29 = smov 105   ;;  %v5304_v57 = vld [vmem:[%s7105_s5 + $0x1f0] sm:$0xff]  }
 0x2f7   : > { %v2246_v62 = vrot.slane %v1877_v58, %v5965_v30  ;;  %v2298_v63 = vcombine.high %v1877_v58, %v1877_v58 }
 0x2f8   : > { %v2217_v59 = vcombine.high %v2191_v55, %v2191_v55  ;;  %v2209_v1 = vrot.slane %v2202_v61, %v5965_v30  ;;  %v2169_v21 = vcombine.high %v2147_v44, %v2147_v44 }
 0x2f9   : > { %v2253_v26 = vrot.slane %v2246_v62, %v5965_v30  ;;  %v2305_v41 = vrot.slane %v2298_v63, %v5965_v30  ;;  %v2261_v32 = vcombine.high %v2246_v62, %v2246_v62 }
 0x2fa   : > { %2012 = vrot.lane.b32.xlu0 %v2011_v9, %s5514_s19  ;;  %1987 = vrot.lane.b32.xlu1 %v1986_v14, %s5515_s20  ;;  %s5528_s19 = smov 37   ;;  %s5529_s20 = smov 3   ;;  %v2228_v53 = vcombine.high %v2209_v1, %v2209_v1 }
 0x2fb   : > { %v2312_v39 = vrot.slane %v2305_v41, %v5965_v30  ;;  %v2268_v45 = vrot.slane %v2261_v32, %v5965_v30  ;;  %v2323_v3 = vcombine.high %v2305_v41, %v2305_v41  ;;  %v2279_v4 = vcombine.high %v2253_v26, %v2253_v26 }
 0x2fd   : > { %v2338_v60 = vcombine.high %v2312_v39, %v2312_v39  ;;  %v2330_v5 = vrot.slane %v2323_v3, %v5965_v30  ;;  %v2290_v6 = vcombine.high %v2268_v45, %v2268_v45 }
 0x2fe   : > { %2071 = vrot.lane.b32.xlu0 %v2070_v20, %s5516_s15  ;;  %2027 = vrot.lane.b32.xlu1 %v2026_v54, %s5517_s16  ;;  %s5524_s15 = smov 84   ;;  %s5525_s16 = smov 63   ;;  %v5311_v20 = vld [vmem:[%s7105_s5 + $0x160] sm:$0xff]  }
 0x2ff   : > { %v2349_v7 = vcombine.high %v2330_v5, %v2330_v5 }
 0x302   : > { %2097 = vrot.lane.b32.xlu0 %v2096_v28, %s5518_s8  ;;  %2046 = vrot.lane.b32.xlu1 %v2045_v35, %s5519_s9  ;;  %s5534_s8 = smov 126   ;;  %s5535_s9 = smov 58   ;;  %v5313_v28 = vld [vmem:[%s7105_s5 + $0x120] sm:$0xff]  }
 0x306   : > { %2089 = vrot.lane.b32.xlu0 %v2088_v40, %s5520_s21  ;;  %2038 = vrot.lane.b32.xlu1 %v2037_v48, %s5521_s22  ;;  %s5530_s21 = smov 24   ;;  %s5531_s22 = smov 71  }
 0x30a   : > { %2159 = vrot.lane.b32.xlu0 %v2158_v0, %s5522_s13  ;;  %2133 = vrot.lane.b32.xlu1 %v2132_v42, %s5523_s14  ;;  %s5536_s13 = smov 45   ;;  %s5537_s14 = smov 11  }
 0x30e   : > { %2192 = vrot.lane.b32.xlu0 %v2191_v55, %s5524_s15  ;;  %2108 = vrot.lane.b32.xlu1 %v2107_v56, %s5525_s16  ;;  %s5538_s15 = smov 79   ;;  %v5303_v56 = vld [vmem:[%s7105_s5 + $0x170] sm:$0xff]   ;;  %s5541_s16 = smov [#allocation4]  }
 0x312   : > { %2218 = vrot.lane.b32.xlu0 %v2217_v59, %s5526_s17  ;;  %2148 = vrot.lane.b32.xlu1 %v2147_v44, %s5527_s18  ;;  %s5433_s17 = sshll.u32 %s5541_s16, 4  ;;  %s5434_s17 = int_to_ptr.vmem [resolvable:$false] %s5433_s17 }
 0x313   : > { %s5435_s18 = scalar_lea.vmem %s5434_s17, 32 }
 0x316   : > { %2210 = vrot.lane.b32.xlu0 %v2209_v1, %s5528_s19  ;;  %2170 = vrot.lane.b32.xlu1 %v2169_v21, %s5529_s20  ;;  %v5305_v21 = vld [vmem:[%s7105_s5 + $0x130] sm:$0xff]  }
 0x31a   : > { %2254 = vrot.lane.b32.xlu0 %v2253_v26, %s5530_s21  ;;  %2229 = vrot.lane.b32.xlu1 %v2228_v53, %s5531_s22  ;;  %v5306_v26 = vld [vmem:[%s7105_s5 + $0x1b0] sm:$0xff]   ;;  %s269_s22 = sand.u32 1, %s5481_s25  }
 0x31e   : > { %2313 = vrot.lane.b32.xlu0 %v2312_v39, %s5532_s23  ;;  %2269 = vrot.lane.b32.xlu1 %v2268_v45, %s5533_s29  ;;  %s4664_s23 = sshll.u32 %s5603_s28, 4  ;;  %s270_s29 = scalar_lea.vmem [#allocation4], %s269_s22 }
 0x31f   : > { %s4237_s28 = scalar_lea.sflag [#allocation5], %s269_s22 }
 0x322   : > { %2339 = vrot.lane.b32.xlu0 %v2338_v60, %s5534_s8  ;;  %2280 = vrot.lane.b32.xlu1 %v2279_v4, %s5535_s9  ;;  %v6706_v4 = vsub.s32 4, %v5962_v23  ;;  %s4249_s8 = sshll.u32 %s270_s29, 4  ;;  %s7061_s8 = int_to_ptr.vmem [resolvable:$true] %s4249_s8 }
 0x323   : > { %p5436_p0 = scmp.lt.s32.totalorder %s7061_s8, %s5434_s17 }
 0x326   : > { %2331 = vrot.lane.b32.xlu0 %v2330_v5, %s5536_s13  ;;  %2291 = vrot.lane.b32.xlu1 %v2290_v6, %s5537_s14  ;;  %v6279_v6 = vsub.s32 1, %v5962_v23  ;;  %s7059_s14 = scalar_lea.hbm %s7107_s7, %s4664_s23 }
 0x32a   : > { %2350 = vrot.lane.b32.xlu1 %v2349_v7, %s5538_s15  ;;  %v6282_v7 = vsub.s32 3, %v5962_v23  ;;  %s5429_s15 = scalar_lea.vmem %s7061_s8, 16 }
 0x32b   : > { %p5430_p11 = scmp.ne.s32.totalorder %s7061_s8, %s5429_s15  ;;  %p5437_p1 = scmp.lt.s32.totalorder %s5435_s18, %s5429_s15 }
 0x32d   : > { %p5431_p12 = pnand %p5430_p11, %p5620_p5  ;;  %p5438_p2 = por %p5437_p1, %p5436_p0 }
 0x32f   : > { %p5432_p13 = pneg %p5431_p12 }
 0x331   : > { %p5439_p3 = pnand %p5438_p2, %p5432_p13 }
 0x360   : > { %v1951_v8 = vpop.permute.xlu0 %1950  ;;  %v1907_v9 = vpop.permute.xlu1 %1906 }
 0x361   : > { %v1908_v30 = vrot.slane %v1907_v9, 7  ;;  %v1952_v2 = vrot.slane %v1951_v8, 7 }
 0x363   : > { %v1910_v10 = vsel %vm1909_vm1, %v1908_v30, %v1907_v9  ;;  %vm6152_vm1 = vcmp.lt.s32.totalorder %v1878_v19, 136  ;;  %v1954_v13 = vsel %vm1953_vm11, %v1952_v2, %v1951_v8  ;;  %vm6188_vm11 = vcmp.lt.s32.totalorder %v1878_v19, 170  ;;  %v5309_v30 = vld [vmem:[%s7105_s5 + $0x128] sm:$0xff]   ;;  %v5312_v2 = vld [vmem:[%s7105_s5 + $0x1e0] sm:$0xff]  }
 0x364   : > { %v1977_v11 = vpop.permute.xlu0 %1976  ;;  %v1918_v12 = vpop.permute.xlu1 %1917  ;;  %1915 = vst.msk [vmem:[#allocation3] sm:$0x3] %vm1914_vm2, %v1910_v10  ;;  %vm1979_vm2 = vcmask 834560   ;;  %v6297_v10 = vsub.s32 0, %v5962_v23 }
 0x365   : > { %1923 = vst.msk [vmem:[#allocation3 + $0x1] sm:$0x1] %vm1922_vm3, %v1918_v12  ;;  %v1978_v29 = vrot.slane %v1977_v11, 7  ;;  %vm1973_vm3 = vmand %vm6119_vm9, %vm6124_vm10  ;;  %vm6183_vm10 = vcmp.ge.s32.totalorder %v1878_v19, 89 }
 0x366   : > { %vm2017_vm9 = vmand %vm6161_vm4, %vm6166_vm5  ;;  %vm2049_vm4 = vcmask 1006592  }
 0x367   : > { %v1980_v43 = vsel %vm1979_vm2, %v1978_v29, %v1977_v11  ;;  %vm2035_vm13 = vmand %vm6183_vm10, %vm6188_vm11  ;;  %vm6217_vm2 = vcmp.ge.s32.totalorder %v1878_v19, 76  ;;  %vm6245_vm10 = vcmp.ge.s32.totalorder %v1878_v19, 110  ;;  %vm6250_vm11 = vcmp.lt.s32.totalorder %v1878_v19, 191 }
 0x368   : > { %v1969_v16 = vpop.permute.xlu0 %1968  ;;  %v1926_v22 = vpop.permute.xlu1 %1925  ;;  %v6300_v11 = vsub.s32 2, %v5962_v23 }
 0x369   : > { %v1927_v25 = vrot.slane %v1926_v22, 7 }
 0x36b   : > { %v1929_v34 = vsel %vm1928_vm8, %v1927_v25, %v1926_v22  ;;  %vm1995_vm8 = vmand %vm6147_vm0, %vm6152_vm1  ;;  %vm6207_vm0 = vcmp.ge.s32.totalorder %v1878_v19, 123  ;;  %vm6212_vm1 = vcmp.lt.s32.totalorder %v1878_v19, 204 }
 0x36c   : > { %v2013_v35 = vpop.permute.xlu0 %2012  ;;  %1934 = vst.msk [vmem:[#allocation3 + $0x1] sm:$0x3] %vm1933_vm12, %v1929_v34  ;;  %v1988_v40 = vpop.permute.xlu1 %1987  ;;  %vm2030_vm12 = vcmask 728064  }
 0x36d   : > { %1959 = vst.msk [vmem:[#allocation3 + $0x2] sm:$0x3] %vm1958_vm15, %v1954_v13  ;;  %v1989_v42 = vrot.slane %v1988_v40, 7  ;;  %vm6202_vm15 = vcmp.lt.s32.totalorder %v1878_v19, 123 }
 0x36e   : > { %1974 = vst.msk [vmem:[#allocation3 + $0x3] sm:$0x1] %vm1973_vm3, %v1969_v16  ;;  %vm6222_vm3 = vcmp.lt.s32.totalorder %v1878_v19, 157  ;;  %vm2043_vm5 = vmand %vm6197_vm14, %vm6202_vm15  ;;  %v2396_v16 = vsub.s32 7, %v5962_v23 }
 0x36f   : > { %1985 = vst.msk [vmem:[#allocation3 + $0x3] sm:$0x3] %vm1984_vm6, %v1980_v43  ;;  %v1991_v48 = vsel %vm1990_vm7, %v1989_v42, %v1988_v40  ;;  %vm6231_vm6 = vcmp.ge.s32.totalorder %v1878_v19, 29  ;;  %vm6236_vm7 = vcmp.lt.s32.totalorder %v1878_v19, 110  ;;  %vm2105_vm15 = vmand %vm6245_vm10, %vm6250_vm11  ;;  %vm6319_vm10 = vcmp.ge.s32.totalorder %v1878_v19, 50 }
 0x370   : > { %v2072_v49 = vpop.permute.xlu0 %2071  ;;  %1996 = vst.msk [vmem:[#allocation3 + $0x4] sm:$0x3] %vm1995_vm8, %v1991_v48  ;;  %v2028_v50 = vpop.permute.xlu1 %2027  ;;  %vm2074_vm8 = vcmask 621568   ;;  %vm2094_vm14 = vmand %vm6231_vm6, %vm6236_vm7  ;;  %vm2151_vm6 = vcmask 793600   ;;  %vm6303_vm7 = vcmp.ge.s32.totalorder %v1878_v19, 97  ;;  %vm6324_vm11 = vcmp.lt.s32.totalorder %v1878_v19, 131 }
 0x371   : > { %v2029_v51 = vrot.slane %v2028_v50, 7  ;;  %2018 = vst.msk [vmem:[#allocation3 + $0x5] sm:$0x1] %vm2017_vm9, %v2013_v35  ;;  %v2073_v44 = vrot.slane %v2072_v49, 7  ;;  %vm2054_vm9 = vmand %vm6207_vm0, %vm6212_vm1  ;;  %vm2111_vm1 = vcmask 515072   ;;  %vm6350_vm0 = vcmp.lt.s32.totalorder %v1878_v19, 165 }
 0x373   : > { %v2031_v0 = vsel %vm2030_vm12, %v2029_v51, %v2028_v50  ;;  %vm2079_vm12 = vmand %vm6217_vm2, %vm6222_vm3  ;;  %v2075_v39 = vsel %vm2074_vm8, %v2073_v44, %v2072_v49  ;;  %vm6269_vm2 = vcmp.ge.s32.totalorder %v1878_v19, 63  ;;  %vm6274_vm3 = vcmp.lt.s32.totalorder %v1878_v19, 144  ;;  %v5301_v49 = vld [vmem:[%s7105_s5 + $0x138] sm:$0xff]  }
 0x374   : > { %v2098_v52 = vpop.permute.xlu0 %2097  ;;  %v2047_v55 = vpop.permute.xlu1 %2046  ;;  %2036 = vst.msk [vmem:[#allocation3 + $0x5] sm:$0x3] %vm2035_vm13, %v2031_v0  ;;  %vm2100_vm13 = vcmask 900096   ;;  %vm2116_vm8 = vmand %vm6269_vm2, %vm6274_vm3  ;;  %v5302_v50 = vld [vmem:[%s7105_s5 + $0x1b8] sm:$0xff]   ;;  %vm6398_vm3 = vcmp.ge.s32.totalorder %v1878_v19, 37  ;;  %vm2221_vm2 = vcmask 965632  }
 0x375   : > { %v2048_v58 = vrot.slane %v2047_v55, 7  ;;  %v2099_v41 = vrot.slane %v2098_v52, 7  ;;  %v5318_v0 = vld [vmem:[%s7105_s5 + $0x198] sm:$0xff]  }
 0x377   : > { %v2050_v32 = vsel %vm2049_vm4, %v2048_v58, %v2047_v55  ;;  %v2101_v60 = vsel %vm2100_vm13, %v2099_v41, %v2098_v52  ;;  %vm6287_vm4 = vcmp.ge.s32.totalorder %v1878_v19, 16  ;;  %vm6335_vm13 = vcmp.ge.s32.totalorder %v1878_v19, 3  ;;  %v5319_v52 = vld [vmem:[%s7105_s5 + $0x150] sm:$0xff]  }
 0x378   : > { %v2090_v1 = vpop.permute.xlu0 %2089  ;;  %v2039_v53 = vpop.permute.xlu1 %2038 }
 0x379   : > { %2044 = vst.msk [vmem:[#allocation3 + $0x6] sm:$0x1] %vm2043_vm5, %v2039_v53  ;;  %vm6292_vm5 = vcmp.lt.s32.totalorder %v1878_v19, 97 }
 0x37a   : > { %2055 = vst.msk [vmem:[#allocation3 + $0x6] sm:$0x3] %vm2054_vm9, %v2050_v32  ;;  %vm6314_vm9 = vcmp.lt.s32.totalorder %v1878_v19, 178  ;;  %v5325_v32 = vld [vmem:[%s7105_s5 + $0x108] sm:$0xff]  }
 0x37b   : > { %2080 = vst.msk [vmem:[#allocation3 + $0x7] sm:$0x3] %vm2079_vm12, %v2075_v39  ;;  %vm2138_vm12 = vmand %vm6287_vm4, %vm6292_vm5  ;;  %vm6403_vm4 = vcmp.lt.s32.totalorder %v1878_v19, 118  ;;  %v5307_v39 = vld [vmem:[%s7105_s5 + $0x168] sm:$0xff]  }
 0x37c   : > { %v6266_v45 = vpop.permute.xlu0 %2159  ;;  %v2134_v3 = vpop.permute.xlu1 %2133  ;;  %2095 = vst.msk [vmem:[#allocation3 + $0x8] sm:$0x1] %vm2094_vm14, %v2090_v1  ;;  %vm6340_vm14 = vcmp.lt.s32.totalorder %v1878_v19, 84 }
 0x37d   : > { %2106 = vst.msk [vmem:[#allocation3 + $0x8] sm:$0x3] %vm2105_vm15, %v2101_v60  ;;  %vm6345_vm15 = vcmp.ge.s32.totalorder %v1878_v19, 84  ;;  %v2161_v36 = vrot.slane %v6266_v45, 7 }
 0x37e   : > { %vm2200_vm5 = vmand %vm6345_vm15, %vm6350_vm0  ;;  %vm2232_vm0 = vcmask 580608  }
 0x380   : > { %v6284_v8 = vpop.permute.xlu0 %2192  ;;  %v2109_v12 = vpop.permute.xlu1 %2108 }
 0x381   : > { %v2110_v17 = vrot.slane %v2109_v12, 7  ;;  %v2194_v51 = vrot.slane %v6284_v8, 7 }
 0x382   : > { %v6332_v54 = vld [vmem:[#allocation3] sm:$0xff] }
 0x383   : > { %v2112_v29 = vsel %vm2111_vm1, %v2110_v17, %v2109_v12  ;;  %v2373_v33 = vrot.slane %v6332_v54, %v6279_v6  ;;  %v2381_v34 = vrot.slane %v6332_v54, %v6282_v7  ;;  %v2369_v35 = vrot.slane %v6332_v54, %v6297_v10  ;;  %vm2156_vm1 = vmand %vm6303_vm7, %vm6314_vm9  ;;  %v5310_v12 = vld [vmem:[%s7105_s5 + $0x1a8] sm:$0xff]  }
 0x384   : > { %v6355_v31 = vpop.permute.xlu0 %2218  ;;  %2117 = vst.msk [vmem:[#allocation3 + $0x9] sm:$0x3] %vm2116_vm8, %v2112_v29  ;;  %v2149_v38 = vpop.permute.xlu1 %2148  ;;  %v2377_v13 = vrot.slane %v6332_v54, %v6300_v11  ;;  %v2389_v40 = vrot.slane %v6332_v54, %v2388_v15  ;;  %v2397_v42 = vrot.slane %v6332_v54, %v2396_v16  ;;  %vm7190_vm8 = vcmask 408576   ;;  %vm7191_vm7 = vmand %vm6319_vm10, %vm6324_vm11  ;;  %v5314_v29 = vld [vmem:[%s7105_s5 + $0x1a0] sm:$0xff]  }
 0x385   : > { %2139 = vst.msk [vmem:[#allocation3 + $0xa] sm:$0x1] %vm2138_vm12, %v2134_v3  ;;  %v2150_v43 = vrot.slane %v2149_v38, 7  ;;  %v2472_v46 = vpack.c.bf16 %v2373_v33, %v2373_v33  ;;  %v2474_v47 = vpack.c.bf16 %v2381_v34, %v2381_v34  ;;  %v2471_v48 = vpack.c.bf16 %v2369_v35, %v2369_v35  ;;  %v5316_v33 = vld [vmem:[%s7105_s5 + $0x1d8] sm:$0xff]   ;;  %v5328_v3 = vld [vmem:[%s7105_s5 + $0x1c0] sm:$0xff]   ;;  %v5337_v35 = vld [vmem:[%s7105_s5 + $0x230] sm:$0xff]  }
 0x386   : > { %v2473_v18 = vpack.c.bf16 %v2377_v13, %v2377_v13  ;;  %vm6419_vm12 = vcmp.ge.s32.totalorder %v1878_v19, 118  ;;  %v2163_v61 = vsel %vm7190_vm8, %v2161_v36, %v6266_v45  ;;  %v2220_v44 = vrot.slane %v6355_v31, 7  ;;  %vm2215_vm8 = vmand %vm6398_vm3, %vm6403_vm4  ;;  %v5308_v45 = vld [vmem:[%s7105_s5 + $0x1e8] sm:$0xff]  }
 0x387   : > { %v2152_v37 = vsel %vm2151_vm6, %v2150_v43, %v2149_v38  ;;  %3825 = vmatprep.mubr.bf16.mxu1 %v2472_v46  ;;  %3865 = vmatprep.mubr.bf16.mxu0 %v2474_v47  ;;  %vm6424_vm6 = vcmp.lt.s32.totalorder %v1878_v19, 199  ;;  %v2476_v63 = vpack.c.bf16 %v2389_v40, %v2389_v40  ;;  %v2478_v1 = vpack.c.bf16 %v2397_v42, %v2397_v42  ;;  %v5339_v38 = vld [vmem:[%s7105_s5 + $0x268] sm:$0xff]   ;;  %v5343_v43 = vld [vmem:[%s7105_s5 + $0x260] sm:$0xff]  }
 0x388   : > { %v2211_v55 = vpop.permute.xlu0 %2210  ;;  %2157 = vst.msk [vmem:[#allocation3 + $0xa] sm:$0x3] %vm2156_vm1, %v2152_v37  ;;  %v2171_v62 = vpop.permute.xlu1 %2170  ;;  %3826 = vmatmul.mubr.bf16.vlgmr.msra.gmra.mxu1 %v2471_v48  ;;  %3866 = vmatmul.mubr.bf16.vlgmr.msra.gmra.mxu0 %v2473_v18  ;;  %vm7192_vm9 = vcmask 687104   ;;  %vm7193_vm1 = vmand %vm6335_vm13, %vm6340_vm14  ;;  %vm6467_vm11 = vcmp.ge.s32.totalorder %v1878_v19, 71  ;;  %vm6488_vm13 = vcmp.ge.s32.totalorder %v1878_v19, 24  ;;  %vm6493_vm14 = vcmp.lt.s32.totalorder %v1878_v19, 105 }
 0x389   : > { %2168 = vst.msk [vmem:[#allocation3 + $0xb] sm:$0x3] %vm7191_vm7, %v2163_v61  ;;  %4772 = vmatpush3.bf16.msra.mxu1 %v5301_v49  ;;  %4794 = vmatpush3.bf16.msra.mxu0 %v5302_v50  ;;  %v2196_v41 = vsel %vm7192_vm9, %v2194_v51, %v6284_v8  ;;  %vm2226_vm10 = vmand %vm6419_vm12, %vm6424_vm6  ;;  %vm6472_vm7 = vcmp.lt.s32.totalorder %v1878_v19, 152  ;;  %v2222_v5 = vsel %vm2221_vm2, %v2220_v44, %v6355_v31  ;;  %vm6524_vm3 = vcmp.ge.s32.totalorder %v1878_v19, 105  ;;  %v5315_v31 = vld [vmem:[%s7105_s5 + $0x158] sm:$0xff]   ;;  %v5320_v18 = vld [vmem:[%s7105_s5 + $0x1d0] sm:$0xff]  }
 0x38a   : > { %2176 = vst.msk [vmem:[#allocation3 + $0xc] sm:$0x1] %vm7193_vm1, %v2171_v62  ;;  %3905 = vmatprep.mubr.bf16.mxu1 %v2476_v63  ;;  %3945 = vmatprep.mubr.bf16.mxu0 %v2478_v1  ;;  %vm2237_vm15 = vmand %vm6467_vm11, %vm6472_vm7  ;;  %vm6529_vm4 = vcmp.lt.s32.totalorder %v1878_v19, 186  ;;  %vm6562_vm6 = vcmp.ge.s32.totalorder %v1878_v19, 58  ;;  %vm6572_vm9 = vcmp.ge.s32.totalorder %v1878_v19, 11  ;;  %vm6577_vm1 = vcmp.lt.s32.totalorder %v1878_v19, 92 }
 0x38b   : > { %2201 = vst.msk [vmem:[#allocation3 + $0xc] sm:$0x3] %vm2200_vm5, %v2196_v41  ;;  %4773 = vmatprep.subr.bf16.mxu1 %v5303_v56  ;;  %4795 = vmatprep.subr.bf16.mxu0 %v5304_v57  ;;  %vm2259_vm2 = vmand %vm6488_vm13, %vm6493_vm14  ;;  %vm2272_vm5 = vcmask 859136   ;;  %vm6587_vm11 = vcmp.ge.s32.totalorder %v1878_v19, 92  ;;  %vm6592_vm7 = vcmp.lt.s32.totalorder %v1878_v19, 173  ;;  %vm6601_vm14 = vcmp.ge.s32.totalorder %v1878_v19, 45 }
 0x38c   : > { %v2255_v60 = vpop.permute.xlu0 %2254  ;;  %2216 = vst.msk [vmem:[#allocation3 + $0xd] sm:$0x1] %vm2215_vm8, %v2211_v55  ;;  %v2230_v8 = vpop.permute.xlu1 %2229  ;;  %vm2277_vm12 = vmand %vm6524_vm3, %vm6529_vm4  ;;  %vm6567_vm8 = vcmp.lt.s32.totalorder %v1878_v19, 139  ;;  %v5317_v51 = vld [vmem:[%s7105_s5 + $0x118] sm:$0xff]   ;;  %vm6627_vm3 = vcmp.ge.s32.totalorder %v1878_v19, 126  ;;  %vm6632_vm4 = vcmp.lt.s32.totalorder %v1878_v19, 207  ;;  %v2385_v14 = vrot.slane %v6332_v54, %v6706_v4 }
 0x38d   : > { %2227 = vst.msk [vmem:[#allocation3 + $0xd] sm:$0x3] %vm2226_vm10, %v2222_v5  ;;  %v2231_v9 = vrot.slane %v2230_v8, 7  ;;  %4774 = vmatpush3.bf16.msra.mxu1 %v5305_v21  ;;  %4796 = vmatpush3.bf16.msra.mxu0 %v5306_v26  ;;  %vm2283_vm10 = vcmask 474112   ;;  %vm2288_vm13 = vmand %vm6562_vm6, %vm6567_vm8  ;;  %v5321_v62 = vld [vmem:[%s7105_s5 + $0x110] sm:$0xff]   ;;  %v5323_v21 = vld [vmem:[%s7105_s5 + $0x148] sm:$0xff]  }
 0x38e   : > { %4775 = vmatprep.subr.bf16.mxu1 %v5307_v39  ;;  %4797 = vmatprep.subr.bf16.mxu0 %v5308_v45  ;;  %v5322_v63 = vld [vmem:[%s7105_s5 + $0x190] sm:$0xff]   ;;  %vm2353_vm6 = vcmask 646144   ;;  %v5326_v39 = vld [vmem:[%s7105_s5 + $0x188] sm:$0xff]   ;;  %v2392_v5 = vsub.s32 6, %v5962_v23  ;;  %v5344_v46 = vld [vmem:[%s7105_s5 + $0x2e0] sm:$0xff]  }
 0x38f   : > { %v2233_v22 = vsel %vm2232_vm0, %v2231_v9, %v2230_v8  ;;  %vm6606_vm0 = vcmp.lt.s32.totalorder %v1878_v19, 126  ;;  %v5340_v13 = vld [vmem:[%s7105_s5 + $0x2e8] sm:$0xff]   ;;  %v5347_v49 = vld [vmem:[%s7105_s5 + $0x258] sm:$0xff]   ;;  %v5353_v37 = vld [vmem:[%s7105_s5 + $0x210] sm:$0xff]  }
 0x390   : > { %v2314_v24 = vpop.permute.xlu0 %2313  ;;  %2238 = vst.msk [vmem:[#allocation3 + $0xe] sm:$0x3] %vm2237_vm15, %v2233_v22  ;;  %v2270_v25 = vpop.permute.xlu1 %2269  ;;  %vm2316_vm15 = vcmask 752640   ;;  %v2393_v17 = vrot.slane %v6332_v54, %v2392_v5  ;;  %v5333_v54 = vld [vmem:[%s7105_s5 + $0x238] sm:$0xff]   ;;  %v5354_v55 = vld [vmem:[%s7105_s5 + $0x290] sm:$0xff]   ;;  %v5359_v61 = vld [vmem:[%s7105_s5 + $0x240] sm:$0xff]  }
 0x391   : > { %2260 = vst.msk [vmem:[#allocation3 + $0xf] sm:$0x1] %vm2259_vm2, %v2255_v60  ;;  %v2271_v27 = vrot.slane %v2270_v25, 7  ;;  %4776 = vmatpush3.bf16.msra.mxu1 %v5309_v30  ;;  %4798 = vmatpush3.bf16.msra.mxu0 %v5310_v12  ;;  %v2315_v47 = vrot.slane %v2314_v24, 7  ;;  %vm2296_vm2 = vmand %vm6572_vm9, %vm6577_vm1  ;;  %v5327_v60 = vld [vmem:[%s7105_s5 + $0x140] sm:$0xff]   ;;  %v5348_v50 = vld [vmem:[%s7105_s5 + $0x2d8] sm:$0xff]  }
 0x392   : > { %4777 = vmatprep.subr.bf16.mxu1 %v5311_v20  ;;  %4799 = vmatprep.subr.bf16.mxu0 %v5312_v2  ;;  %vm2336_vm9 = vmand %vm6601_vm14, %vm6606_vm0  ;;  %v5329_v30 = vld [vmem:[%s7105_s5 + $0x100] sm:$0xff]   ;;  %v5331_v20 = vld [vmem:[%s7105_s5 + $0x278] sm:$0xff]   ;;  %vm4234_vm14 = vcmask 516096  }
 0x393   : > { %v2273_v36 = vsel %vm2272_vm5, %v2271_v27, %v2270_v25  ;;  %vm2321_vm5 = vmand %vm6587_vm11, %vm6592_vm7  ;;  %v2317_v59 = vsel %vm2316_vm15, %v2315_v47, %v2314_v24  ;;  %vm6660_vm11 = vcmp.lt.s32.totalorder %v1878_v19, 160  ;;  %v5330_v12 = vld [vmem:[%s7105_s5 + $0x180] sm:$0xff]   ;;  %v5332_v2 = vld [vmem:[%s7105_s5 + $0x2f8] sm:$0xff]   ;;  %v2475_v25 = vpack.c.bf16 %v2385_v14, %v2385_v14 }
 0x394   : > { %2278 = vst.msk [vmem:[#allocation3 + $0xf] sm:$0x3] %vm2277_vm12, %v2273_v36  ;;  %v2340_v40 = vpop.permute.xlu0 %2339  ;;  %v2281_v42 = vpop.permute.xlu1 %2280  ;;  %vm2342_vm12 = vcmask 1031168   ;;  %vm2347_vm1 = vmand %vm6627_vm3, %vm6632_vm4  ;;  %v2477_v27 = vpack.c.bf16 %v2393_v17, %v2393_v17  ;;  %v5338_v36 = vld [vmem:[%s7105_s5 + $0x2b0] sm:$0xff]   ;;  %v5345_v47 = vld [vmem:[%s7105_s5 + $0x220] sm:$0xff]   ;;  %vm5540_vm7 = vmmov 0  }
 0x395   : > { %v2282_v48 = vrot.slane %v2281_v42, 7  ;;  %4778 = vmatpush3.bf16.msra.mxu1 %v5313_v28  ;;  %4800 = vmatpush3.bf16.msra.mxu0 %v5314_v29  ;;  %v2341_v56 = vrot.slane %v2340_v40, 7  ;;  %v5334_v28 = vld [vmem:[%s7105_s5 + $0x2b8] sm:$0xff]   ;;  %v5360_v44 = vld [vmem:[%s7105_s5 + $0x2c0] sm:$0xff]   ;;  %v5368_v23 = vld [vmem:[%s7105_s5 + $0x3f0] sm:$0xff]  }
 0x396   : > { %4779 = vmatprep.subr.bf16.mxu1 %v5315_v31  ;;  %4801 = vmatprep.subr.bf16.mxu0 %v5316_v33  ;;  %v5335_v31 = vld [vmem:[%s7105_s5 + $0x270] sm:$0xff]   ;;  %v5372_v14 = vld [vmem:[%s7105_s5 + $0x3e8] sm:$0xff]  }
 0x397   : > { %v2284_v57 = vsel %vm2283_vm10, %v2282_v48, %v2281_v42  ;;  %vm6655_vm10 = vcmp.ge.s32.totalorder %v1878_v19, 79  ;;  %v5324_v19 = vld [vmem:[%s7105_s5 + $0x1c8] sm:$0xff]   ;;  %v2343_v26 = vsel %vm2342_vm12, %v2341_v56, %v2340_v40  ;;  %v5336_v33 = vld [vmem:[%s7105_s5 + $0x2f0] sm:$0xff]   ;;  %v5346_v48 = vld [vmem:[%s7105_s5 + $0x2a0] sm:$0xff]  }
 0x398   : > { %v2292_v58 = vpop.permute.xlu1 %2291  ;;  %2289 = vst.msk [vmem:[#allocation3 + $0x10] sm:$0x3] %vm2288_vm13, %v2284_v57  ;;  %v2332_v1 = vpop.permute.xlu0 %2331  ;;  %vm2358_vm8 = vmand %vm6655_vm10, %vm6660_vm11  ;;  %v5341_v40 = vld [vmem:[%s7105_s5 + $0x228] sm:$0xff]   ;;  %vm3789_vm13 = vcmask 261120  }
 0x399   : > { %2297 = vst.msk [vmem:[#allocation3 + $0x11] sm:$0x1] %vm2296_vm2, %v2292_v58  ;;  %4780 = vmatpush3.bf16.msra.mxu1 %v5317_v51  ;;  %4802 = vmatpush3.bf16.msra.mxu0 %v5318_v0  ;;  %v5342_v42 = vld [vmem:[%s7105_s5 + $0x2a8] sm:$0xff]   ;;  %v5349_v51 = vld [vmem:[%s7105_s5 + $0x218] sm:$0xff]  }
 0x39a   : > { %2322 = vst.msk [vmem:[#allocation3 + $0x11] sm:$0x3] %vm2321_vm5, %v2317_v59  ;;  %4781 = vmatprep.subr.bf16.mxu1 %v5319_v52  ;;  %4803 = vmatprep.subr.bf16.mxu0 %v5320_v18  ;;  %v5350_v0 = vld [vmem:[%s7105_s5 + $0x298] sm:$0xff]   ;;  %v5351_v52 = vld [vmem:[%s7105_s5 + $0x250] sm:$0xff]   ;;  %v5355_v56 = vld [vmem:[%s7105_s5 + $0x248] sm:$0xff]  }
 0x39b   : > { %2337 = vst.msk [vmem:[#allocation3 + $0x12] sm:$0x1] %vm2336_vm9, %v2332_v1  ;;  %v6697_v45 = vld [vmem:[#allocation3 + $0x8] sm:$0xff]  ;;  %v5352_v18 = vld [vmem:[%s7105_s5 + $0x2d0] sm:$0xff]  }
 0x39c   : > { %v2351_v41 = vpop.permute.xlu1 %2350  ;;  %2348 = vst.msk [vmem:[#allocation3 + $0x12] sm:$0x3] %vm2347_vm1, %v2343_v26  ;;  %v6716_v9 = vrot.slane %v6697_v45, %v2392_v5  ;;  %v2405_v22 = vrot.slane %v6697_v45, %v6279_v6  ;;  %v2413_v24 = vrot.slane %v6697_v45, %v6282_v7  ;;  %v5356_v57 = vld [vmem:[%s7105_s5 + $0x2c8] sm:$0xff]   ;;  %v2401_v1 = vrot.slane %v6697_v45, %v6297_v10  ;;  %v5364_v26 = vld [vmem:[%s7105_s5 + $0x3f8] sm:$0xff]  }
 0x39d   : > { %v2352_v53 = vrot.slane %v2351_v41, 7  ;;  %4782 = vmatpush3.bf16.msra.mxu1 %v5321_v62  ;;  %4804 = vmatpush3.bf16.msra.mxu0 %v5322_v63  ;;  %v5357_v58 = vld [vmem:[%s7105_s5 + $0x208] sm:$0xff]   ;;  %v5361_v62 = vld [vmem:[%s7105_s5 + $0x200] sm:$0xff]  }
 0x39e   : > { %4783 = vmatprep.subr.bf16.mxu1 %v5323_v21  ;;  %4805 = vmatprep.subr.bf16.mxu0 %v5324_v19  ;;  %v2480_v29 = vpack.c.bf16 %v2405_v22, %v2405_v22  ;;  %v2482_v34 = vpack.c.bf16 %v2413_v24, %v2413_v24  ;;  %v5358_v59 = vld [vmem:[%s7105_s5 + $0x288] sm:$0xff]   ;;  %v5362_v63 = vld [vmem:[%s7105_s5 + $0x280] sm:$0xff]   ;;  %v5363_v21 = vld [vmem:[%s7105_s5 + $0x378] sm:$0xff]   ;;  %v2409_v19 = vrot.slane %v6697_v45, %v6300_v11 }
 0x39f   : > { %v2354_v8 = vsel %vm2353_vm6, %v2352_v53, %v2351_v41  ;;  %v2421_v41 = vrot.slane %v6697_v45, %v2388_v15  ;;  %v5365_v53 = vld [vmem:[%s7105_s5 + $0x338] sm:$0xff]   ;;  %v5367_v15 = vld [vmem:[%s7105_s5 + $0x370] sm:$0xff]   ;;  %v5373_v17 = vld [vmem:[%s7105_s5 + $0x328] sm:$0xff]  }
 0x3a0   : > { %2359 = vst.msk [vmem:[#allocation3 + $0x13] sm:$0x3] %vm2358_vm8, %v2354_v8  ;;  %v5369_v8 = vld [vmem:[%s7105_s5 + $0x330] sm:$0xff]   ;;  %v5376_v22 = vld [vmem:[%s7105_s5 + $0x3e0] sm:$0xff]  }
 0x3a1   : > { %4784 = vmatpush3.bf16.msra.mxu1 %v5325_v32  ;;  %4806 = vmatpush3.bf16.msra.mxu0 %v5326_v39  ;;  %v2429_v32 = vrot.slane %v6697_v45, %v2396_v16  ;;  %v2479_v39 = vpack.c.bf16 %v2401_v1, %v2401_v1  ;;  %v2484_v5 = vpack.c.bf16 %v2421_v41, %v2421_v41  ;;  %v5377_v24 = vld [vmem:[%s7105_s5 + $0x320] sm:$0xff]   ;;  %v5412_v41 = vld [vmem:[%s7105_s5 + $0x4d8] sm:$0xff]  }
 0x3a2   : > { %4785 = vmatprep.subr.bf16.mxu1 %v5327_v60  ;;  %4807 = vmatprep.subr.bf16.mxu0 %v5328_v3  ;;  %v5366_v60 = vld [vmem:[%s7105_s5 + $0x3b8] sm:$0xff]   ;;  %v2481_v3 = vpack.c.bf16 %v2409_v19, %v2409_v19  ;;  %v5408_v1 = vld [vmem:[%s7105_s5 + $0x4e0] sm:$0xff]  }
 0x3a3   : > { %v2486_v16 = vpack.c.bf16 %v2429_v32, %v2429_v32  ;;  %v5410_v19 = vld [vmem:[%s7105_s5 + $0x4a0] sm:$0xff]   ;;  %v5414_v32 = vld [vmem:[%s7105_s5 + $0x498] sm:$0xff]  }
 0x3a5   : > { %4786 = vmatpush3.bf16.msra.mxu1 %v5329_v30  ;;  %4808 = vmatpush3.bf16.msra.mxu0 %v5330_v12  ;;  %v5370_v30 = vld [vmem:[%s7105_s5 + $0x3b0] sm:$0xff]   ;;  %v5371_v12 = vld [vmem:[%s7105_s5 + $0x368] sm:$0xff]  }
 0x3a6   : > { %4815 = vmatprep.subr.bf16.mxu1 %v5331_v20  ;;  %4837 = vmatprep.subr.bf16.mxu0 %v5332_v2  ;;  %v5374_v20 = vld [vmem:[%s7105_s5 + $0x3a8] sm:$0xff]   ;;  %v5375_v2 = vld [vmem:[%s7105_s5 + $0x360] sm:$0xff]  }
 0x3a8   : > { %3906 = vmatmul.mubr.bf16.vlgmr.msra.gmra.mxu1 %v2475_v25  ;;  %3946 = vmatmul.mubr.bf16.vlgmr.msra.gmra.mxu0 %v2477_v27  ;;  %v5379_v25 = vld [vmem:[%s7105_s5 + $0x358] sm:$0xff]  }
 0x3a9   : > { %4816 = vmatpush3.bf16.msra.mxu1 %v5333_v54  ;;  %3985 = vmatprep.mubr.bf16.mxu1 %v2480_v29  ;;  %v5378_v54 = vld [vmem:[%s7105_s5 + $0x3a0] sm:$0xff]   ;;  %v5380_v27 = vld [vmem:[%s7105_s5 + $0x3d8] sm:$0xff]  }
 0x3aa   : > { %4838 = vmatpush3.bf16.msra.mxu0 %v5334_v28  ;;  %4025 = vmatprep.mubr.bf16.mxu0 %v2482_v34  ;;  %v5381_v28 = vld [vmem:[%s7105_s5 + $0x318] sm:$0xff]   ;;  %v5385_v34 = vld [vmem:[%s7105_s5 + $0x310] sm:$0xff]  }
 0x3ab   : > { %4817 = vmatprep.subr.bf16.mxu1 %v5335_v31  ;;  %4839 = vmatprep.subr.bf16.mxu0 %v5336_v33  ;;  %v5382_v29 = vld [vmem:[%s7105_s5 + $0x398] sm:$0xff]   ;;  %v5383_v31 = vld [vmem:[%s7105_s5 + $0x350] sm:$0xff]  }
 0x3ac   : > { %v5384_v33 = vld [vmem:[%s7105_s5 + $0x3d0] sm:$0xff]  }
 0x3ad   : > { %4818 = vmatpush3.bf16.msra.mxu1 %v5337_v35  ;;  %v5386_v35 = vld [vmem:[%s7105_s5 + $0x390] sm:$0xff]  }
 0x3ae   : > { %4840 = vmatpush3.bf16.msra.mxu0 %v5338_v36  ;;  %4819 = vmatprep.subr.bf16.mxu1 %v5339_v38  ;;  %v5387_v36 = vld [vmem:[%s7105_s5 + $0x348] sm:$0xff]  }
 0x3af   : > { %4841 = vmatprep.subr.bf16.mxu0 %v5340_v13  ;;  %v5388_v38 = vld [vmem:[%s7105_s5 + $0x3c8] sm:$0xff]  }
 0x3b0   : > { %v5389_v13 = vld [vmem:[%s7105_s5 + $0x308] sm:$0xff]  }
 0x3b1   : > { %4820 = vmatpush3.bf16.msra.mxu1 %v5341_v40  ;;  %v5390_v40 = vld [vmem:[%s7105_s5 + $0x388] sm:$0xff]  }
 0x3b2   : > { %4842 = vmatpush3.bf16.msra.mxu0 %v5342_v42  ;;  %4821 = vmatprep.subr.bf16.mxu1 %v5343_v43  ;;  %v5391_v42 = vld [vmem:[%s7105_s5 + $0x340] sm:$0xff]  }
 0x3b3   : > { %4843 = vmatprep.subr.bf16.mxu0 %v5344_v46  ;;  %v5392_v43 = vld [vmem:[%s7105_s5 + $0x3c0] sm:$0xff]  }
 0x3b4   : > { %v5393_v46 = vld [vmem:[%s7105_s5 + $0x300] sm:$0xff]  }
 0x3b5   : > { %4822 = vmatpush3.bf16.msra.mxu1 %v5345_v47  ;;  %v6930_v47 = vld [vmem:[#allocation3 + $0x10] sm:$0x1f] }
 0x3b6   : > { %4844 = vmatpush3.bf16.msra.mxu0 %v5346_v48  ;;  %4823 = vmatprep.subr.bf16.mxu1 %v5347_v49  ;;  %v5394_v48 = vld [vmem:[%s7105_s5 + $0x380] sm:$0xff]   ;;  %v2417_v49 = vrot.slane %v6697_v45, %v6706_v4  ;;  %v2445_v45 = vrot.slane %v6930_v47, %v6282_v7  ;;  %v5400_v7 = vld [vmem:[%s7105_s5 + $0x4f0] sm:$0xff]  }
 0x3b7   : > { %4845 = vmatprep.subr.bf16.mxu0 %v5348_v50  ;;  %v5395_v50 = vld [vmem:[%s7105_s5 + $0x478] sm:$0xff]  }
 0x3b9   : > { %4824 = vmatpush3.bf16.msra.mxu1 %v5349_v51  ;;  %v5396_v51 = vld [vmem:[%s7105_s5 + $0x4f8] sm:$0xff]  }
 0x3ba   : > { %4846 = vmatpush3.bf16.msra.mxu0 %v5350_v0  ;;  %4825 = vmatprep.subr.bf16.mxu1 %v5351_v52  ;;  %v2437_v0 = vrot.slane %v6930_v47, %v6279_v6  ;;  %v5397_v52 = vld [vmem:[%s7105_s5 + $0x438] sm:$0xff]   ;;  %v5399_v6 = vld [vmem:[%s7105_s5 + $0x470] sm:$0xff]  }
 0x3bb   : > { %4847 = vmatprep.subr.bf16.mxu0 %v5352_v18  ;;  %v2483_v18 = vpack.c.bf16 %v2417_v49, %v2417_v49 }
 0x3bd   : > { %4826 = vmatpush3.bf16.msra.mxu1 %v5353_v37  ;;  %v5398_v37 = vld [vmem:[%s7105_s5 + $0x4b8] sm:$0xff]  }
 0x3be   : > { %4848 = vmatpush3.bf16.msra.mxu0 %v5354_v55  ;;  %4827 = vmatprep.subr.bf16.mxu1 %v5355_v56  ;;  %v2485_v55 = vpack.c.bf16 %v6716_v9, %v6716_v9  ;;  %v2488_v56 = vpack.c.bf16 %v2437_v0, %v2437_v0  ;;  %v5402_v9 = vld [vmem:[%s7105_s5 + $0x4b0] sm:$0xff]  }
 0x3bf   : > { %4849 = vmatprep.subr.bf16.mxu0 %v5356_v57  ;;  %v2490_v57 = vpack.c.bf16 %v2445_v45, %v2445_v45 }
 0x3c1   : > { %4828 = vmatpush3.bf16.msra.mxu1 %v5357_v58  ;;  %v5401_v58 = vld [vmem:[%s7105_s5 + $0x430] sm:$0xff]  }
 0x3c2   : > { %4850 = vmatpush3.bf16.msra.mxu0 %v5358_v59  ;;  %4829 = vmatprep.subr.bf16.mxu1 %v5359_v61  ;;  %v5403_v59 = vld [vmem:[%s7105_s5 + $0x468] sm:$0xff]  }
 0x3c3   : > { %4851 = vmatprep.subr.bf16.mxu0 %v5360_v44  ;;  %v5404_v61 = vld [vmem:[%s7105_s5 + $0x4e8] sm:$0xff]  }
 0x3c4   : > { %v5405_v44 = vld [vmem:[%s7105_s5 + $0x428] sm:$0xff]  }
 0x3c5   : > { %4830 = vmatpush3.bf16.msra.mxu1 %v5361_v62  ;;  %v5406_v62 = vld [vmem:[%s7105_s5 + $0x4a8] sm:$0xff]  }
 0x3c6   : > { %4852 = vmatpush3.bf16.msra.mxu0 %v5362_v63  ;;  %4859 = vmatprep.subr.bf16.mxu1 %v5363_v21  ;;  %v5407_v63 = vld [vmem:[%s7105_s5 + $0x460] sm:$0xff]  }
 0x3c7   : > { %4881 = vmatprep.subr.bf16.mxu0 %v5364_v26  ;;  %v5409_v21 = vld [vmem:[%s7105_s5 + $0x420] sm:$0xff]   ;;  %v5411_v26 = vld [vmem:[%s7105_s5 + $0x458] sm:$0xff]  }
 0x3c8   : > { %3986 = vmatmul.mubr.bf16.vlgmr.msra.gmra.mxu1 %v2479_v39  ;;  %v5415_v39 = vld [vmem:[%s7105_s5 + $0x450] sm:$0xff]  }
 0x3c9   : > { %4026 = vmatmul.mubr.bf16.vlgmr.msra.gmra.mxu0 %v2481_v3  ;;  %4860 = vmatpush3.bf16.msra.mxu1 %v5365_v53  ;;  %v5413_v53 = vld [vmem:[%s7105_s5 + $0x418] sm:$0xff]   ;;  %v5417_v3 = vld [vmem:[%s7105_s5 + $0x410] sm:$0xff]  }
 0x3ca   : > { %4065 = vmatprep.mubr.bf16.mxu1 %v2484_v5  ;;  %4882 = vmatpush3.bf16.msra.mxu0 %v5366_v60  ;;  %v5416_v60 = vld [vmem:[%s7105_s5 + $0x4d0] sm:$0xff]   ;;  %v5419_v5 = vld [vmem:[%s7105_s5 + $0x448] sm:$0xff]  }
 0x3cb   : > { %4105 = vmatprep.mubr.bf16.mxu0 %v2486_v16  ;;  %4861 = vmatprep.subr.bf16.mxu1 %v5367_v15  ;;  %v5418_v15 = vld [vmem:[%s7105_s5 + $0x490] sm:$0xff]   ;;  %v5421_v16 = vld [vmem:[%s7105_s5 + $0x408] sm:$0xff]  }
 0x3cc   : > { %4883 = vmatprep.subr.bf16.mxu0 %v5368_v23  ;;  %v5420_v23 = vld [vmem:[%s7105_s5 + $0x4c8] sm:$0xff]  }
 0x3cd   : > { %4862 = vmatpush3.bf16.msra.mxu1 %v5369_v8  ;;  %v5422_v8 = vld [vmem:[%s7105_s5 + $0x488] sm:$0xff]  }
 0x3ce   : > { %4884 = vmatpush3.bf16.msra.mxu0 %v5370_v30  ;;  %4863 = vmatprep.subr.bf16.mxu1 %v5371_v12  ;;  %v5423_v30 = vld [vmem:[%s7105_s5 + $0x440] sm:$0xff]  }
 0x3cf   : > { %4885 = vmatprep.subr.bf16.mxu0 %v5372_v14  ;;  %v5424_v12 = vld [vmem:[%s7105_s5 + $0x4c0] sm:$0xff]  }
 0x3d0   : > { %v5425_v14 = vld [vmem:[%s7105_s5 + $0x400] sm:$0xff]  }
 0x3d1   : > { %4864 = vmatpush3.bf16.msra.mxu1 %v5373_v17  ;;  %v5426_v17 = vld [vmem:[%s7105_s5 + $0x480] sm:$0xff]  }
 0x3d2   : > { %4886 = vmatpush3.bf16.msra.mxu0 %v5374_v20  ;;  %4865 = vmatprep.subr.bf16.mxu1 %v5375_v2  ;;  %v2433_v20 = vrot.slane %v6930_v47, %v6297_v10  ;;  %v2441_v2 = vrot.slane %v6930_v47, %v6300_v11  ;;  %v5428_v10 = vld [vmem:[%s7105_s5 + $0x500] sm:$0xff]   ;;  %v2449_v11 = vrot.slane %v6930_v47, %v6706_v4 }
 0x3d3   : > { %4887 = vmatprep.subr.bf16.mxu0 %v5376_v22  ;;  %v5427_v22 = vld [vmem:[%s7105_s5 + $0x508] sm:$0xff]  }
 0x3d5   : > { %4866 = vmatpush3.bf16.msra.mxu1 %v5377_v24  ;;  %v2487_v24 = vpack.c.bf16 %v2433_v20, %v2433_v20 }
 0x3d6   : > { %4888 = vmatpush3.bf16.msra.mxu0 %v5378_v54  ;;  %4867 = vmatprep.subr.bf16.mxu1 %v5379_v25  ;;  %v5539_v54 = vmov 0.0   ;;  %v2489_v25 = vpack.c.bf16 %v2441_v2, %v2441_v2 }
 0x3d7   : > { %4889 = vmatprep.subr.bf16.mxu0 %v5380_v27  ;;  %v2491_v27 = vpack.c.bf16 %v2449_v11, %v2449_v11 }
 0x3d9   : > { %4868 = vmatpush3.bf16.msra.mxu1 %v5381_v28 }
 0x3da   : > { %4890 = vmatpush3.bf16.msra.mxu0 %v5382_v29  ;;  %4869 = vmatprep.subr.bf16.mxu1 %v5383_v31  ;;  %v2816_v31 = vld [vmem:[%s7106_s6] sm:$0x1] }
 0x3db   : > { %4891 = vmatprep.subr.bf16.mxu0 %v5384_v33 }
 0x3dd   : > { %4870 = vmatpush3.bf16.msra.mxu1 %v5385_v34 }
 0x3de   : > { %4892 = vmatpush3.bf16.msra.mxu0 %v5386_v35  ;;  %4871 = vmatprep.subr.bf16.mxu1 %v5387_v36 }
 0x3df   : > { %4893 = vmatprep.subr.bf16.mxu0 %v5388_v38 }
 0x3e1   : > { %4872 = vmatpush3.bf16.msra.mxu1 %v5389_v13 }
 0x3e2   : > { %4894 = vmatpush3.bf16.msra.mxu0 %v5390_v40  ;;  %4873 = vmatprep.subr.bf16.mxu1 %v5391_v42 }
 0x3e3   : > { %4895 = vmatprep.subr.bf16.mxu0 %v5392_v43 }
 0x3e5   : > { %4874 = vmatpush3.bf16.msra.mxu1 %v5393_v46 }
 0x3e6   : > { %4896 = vmatpush3.bf16.msra.mxu0 %v5394_v48  ;;  %4903 = vmatprep.subr.bf16.mxu1 %v5395_v50 }
 0x3e7   : > { %4925 = vmatprep.subr.bf16.mxu0 %v5396_v51 }
 0x3e8   : > { %4066 = vmatmul.mubr.bf16.vlgmr.msra.gmra.mxu1 %v2483_v18 }
 0x3e9   : > { %4106 = vmatmul.mubr.bf16.vlgmr.msra.gmra.mxu0 %v2485_v55  ;;  %4904 = vmatpush3.bf16.msra.mxu1 %v5397_v52 }
 0x3ea   : > { %4145 = vmatprep.mubr.bf16.mxu1 %v2488_v56  ;;  %4926 = vmatpush3.bf16.msra.mxu0 %v5398_v37 }
 0x3eb   : > { %4185 = vmatprep.mubr.bf16.mxu0 %v2490_v57  ;;  %4905 = vmatprep.subr.bf16.mxu1 %v5399_v6 }
 0x3ec   : > { %4927 = vmatprep.subr.bf16.mxu0 %v5400_v7 }
 0x3ed   : > { %4906 = vmatpush3.bf16.msra.mxu1 %v5401_v58 }
 0x3ee   : > { %4928 = vmatpush3.bf16.msra.mxu0 %v5402_v9  ;;  %4907 = vmatprep.subr.bf16.mxu1 %v5403_v59 }
 0x3ef   : > { %4929 = vmatprep.subr.bf16.mxu0 %v5404_v61 }
 0x3f1   : > { %4908 = vmatpush3.bf16.msra.mxu1 %v5405_v44 }
 0x3f2   : > { %4930 = vmatpush3.bf16.msra.mxu0 %v5406_v62  ;;  %4909 = vmatprep.subr.bf16.mxu1 %v5407_v63 }
 0x3f3   : > { %4931 = vmatprep.subr.bf16.mxu0 %v5408_v1 }
 0x3f5   : > { %4910 = vmatpush3.bf16.msra.mxu1 %v5409_v21 }
 0x3f6   : > { %4932 = vmatpush3.bf16.msra.mxu0 %v5410_v19  ;;  %4911 = vmatprep.subr.bf16.mxu1 %v5411_v26 }
 0x3f7   : > { %4933 = vmatprep.subr.bf16.mxu0 %v5412_v41 }
 0x3f9   : > { %4912 = vmatpush3.bf16.msra.mxu1 %v5413_v53 }
 0x3fa   : > { %4934 = vmatpush3.bf16.msra.mxu0 %v5414_v32  ;;  %4913 = vmatprep.subr.bf16.mxu1 %v5415_v39 }
 0x3fb   : > { %4935 = vmatprep.subr.bf16.mxu0 %v5416_v60 }
 0x3fd   : > { %4914 = vmatpush3.bf16.msra.mxu1 %v5417_v3 }
 0x3fe   : > { %4936 = vmatpush3.bf16.msra.mxu0 %v5418_v15  ;;  %4915 = vmatprep.subr.bf16.mxu1 %v5419_v5 }
 0x3ff   : > { %4937 = vmatprep.subr.bf16.mxu0 %v5420_v23 }
 0x401   : > { %4916 = vmatpush3.bf16.msra.mxu1 %v5421_v16 }
 0x402   : > { %4938 = vmatpush3.bf16.msra.mxu0 %v5422_v8  ;;  %4917 = vmatprep.subr.bf16.mxu1 %v5423_v30 }
 0x403   : > { %4939 = vmatprep.subr.bf16.mxu0 %v5424_v12 }
 0x405   : > { %4918 = vmatpush3.bf16.msra.mxu1 %v5425_v14 }
 0x406   : > { %4940 = vmatpush3.bf16.msra.mxu0 %v5426_v17  ;;  %4950 = vmatprep.subr.bf16.mxu1 %v5539_v54 }
 0x408   : > { %4146 = vmatmul.mubr.bf16.vlgmr.msra.gmra.mxu1 %v2487_v24 }
 0x409   : > { %4186 = vmatmul.mubr.bf16.vlgmr.msra.gmra.mxu0 %v2489_v25  ;;  %4951 = vmatpush3.bf16.msra.mxu1 %v5427_v22 }
 0x40a   : > { %4952 = vmatprep.subr.bf16.mxu1 %v5539_v54  ;;  %4954 = vmatprep.mubr.msk.bf16.mxu1 %vm5540_vm7, %v5539_v54 }
 0x40d   : > { %4953 = vmatpush3.bf16.msra.mxu1 %v5428_v10 }
 0x410   : > { %4955 = vmatmul.mubr.msk.bf16.vlgmr.msra.gmra.mxu1 %vm3789_vm13, %v2491_v27 }
 0x448   : > { %v4743_v28 = vpop.f32.mrf.mxu1  ;;  %v4765_v29 = vpop.f32.mrf.mxu0 }
 0x44a   : > { %v4744_v33 = vpop.f32.mrf.mxu1  ;;  %v4766_v34 = vpop.f32.mrf.mxu0 }
 0x44b   : > { %v4745_v35 = vadd.f32 %v4744_v33, %v4743_v28  ;;  %v4767_v36 = vadd.f32 %v4766_v34, %v4765_v29 }
 0x44c   : > { %v4746_v38 = vpop.f32.mrf.mxu1  ;;  %v4768_v13 = vpop.f32.mrf.mxu0 }
 0x44d   : > { %v3828_v40 = vadd.f32 %v4745_v35, %v2816_v31 }
 0x44e   : > { %v4747_v42 = vpop.f32.mrf.mxu1  ;;  %v4769_v43 = vpop.f32.mrf.mxu0 }
 0x44f   : > { %v3868_v4 = vadd.f32 %v4767_v36, %v3828_v40 }
 0x468   : > { %v4787_v46 = vpop.f32.mrf.mxu1  ;;  %v4809_v47 = vpop.f32.mrf.mxu0 }
 0x46a   : > { %v4788_v48 = vpop.f32.mrf.mxu1  ;;  %v4810_v49 = vpop.f32.mrf.mxu0 }
 0x46b   : > { %v4789_v50 = vadd.f32 %v4788_v48, %v4787_v46  ;;  %v4811_v51 = vadd.f32 %v4810_v49, %v4809_v47 }
 0x46c   : > { %v4790_v0 = vpop.f32.mrf.mxu1  ;;  %v4812_v52 = vpop.f32.mrf.mxu0 }
 0x46d   : > { %v3908_v45 = vadd.f32 %v4789_v50, %v3868_v4 }
 0x46e   : > { %v4791_v18 = vpop.f32.mrf.mxu1  ;;  %v4813_v37 = vpop.f32.mrf.mxu0 }
 0x46f   : > { %v3948_v55 = vadd.f32 %v4811_v51, %v3908_v45 }
 0x488   : > { %v4831_v6 = vpop.f32.mrf.mxu1 }
 0x489   : > { %v4853_v56 = vpop.f32.mrf.mxu0 }
 0x48a   : > { %v4832_v7 = vpop.f32.mrf.mxu1 }
 0x48b   : > { %v4854_v57 = vpop.f32.mrf.mxu0  ;;  %v4833_v53 = vadd.f32 %v4832_v7, %v4831_v6 }
 0x48c   : > { %v4834_v58 = vpop.f32.mrf.mxu1  ;;  %v4855_v39 = vadd.f32 %v4854_v57, %v4853_v56 }
 0x48d   : > { %v4856_v9 = vpop.f32.mrf.mxu0  ;;  %v3988_v32 = vadd.f32 %v4833_v53, %v3948_v55 }
 0x48e   : > { %v4835_v59 = vpop.f32.mrf.mxu1 }
 0x48f   : > { %v4857_v61 = vpop.f32.mrf.mxu0  ;;  %v4028_v3 = vadd.f32 %v4855_v39, %v3988_v32 }
 0x4a8   : > { %v4875_v44 = vpop.f32.mrf.mxu1 }
 0x4a9   : > { %v4897_v62 = vpop.f32.mrf.mxu0 }
 0x4aa   : > { %v4876_v63 = vpop.f32.mrf.mxu1 }
 0x4ab   : > { %v4898_v1 = vpop.f32.mrf.mxu0  ;;  %v4877_v60 = vadd.f32 %v4876_v63, %v4875_v44 }
 0x4ac   : > { %v4878_v21 = vpop.f32.mrf.mxu1  ;;  %v4899_v23 = vadd.f32 %v4898_v1, %v4897_v62 }
 0x4ad   : > { %v4900_v19 = vpop.f32.mrf.mxu0  ;;  %v4068_v15 = vadd.f32 %v4877_v60, %v4028_v3 }
 0x4ae   : > { %v4879_v26 = vpop.f32.mrf.mxu1 }
 0x4af   : > { %v4901_v41 = vpop.f32.mrf.mxu0  ;;  %v4108_v30 = vadd.f32 %v4899_v23, %v4068_v15 }
 0x4c8   : > { %v4919_v5 = vpop.f32.mrf.mxu1 }
 0x4c9   : > { %v4941_v16 = vpop.f32.mrf.mxu0 }
 0x4ca   : > { %v4920_v8 = vpop.f32.mrf.mxu1 }
 0x4cb   : > { %v4921_v12 = vadd.f32 %v4920_v8, %v4919_v5  ;;  %v4942_v14 = vpop.f32.mrf.mxu0 }
 0x4cc   : > { %v4922_v17 = vpop.f32.mrf.mxu1  ;;  %v4943_v2 = vadd.f32 %v4942_v14, %v4941_v16 }
 0x4cd   : > { %v4148_v20 = vadd.f32 %v4921_v12, %v4108_v30  ;;  %v4944_v22 = vpop.f32.mrf.mxu0 }
 0x4ce   : > { %v4923_v24 = vpop.f32.mrf.mxu1 }
 0x4cf   : > { %v4945_v54 = vpop.f32.mrf.mxu0  ;;  %v4188_v25 = vadd.f32 %v4943_v2, %v4148_v20 }
 0x4d0   : > { %v4227_v10 = vpop.f32.mrf.mxu1 }
 0x4d1   : > { %v4228_v11 = vadd.f32 %v4227_v10, %v4188_v25 }
 0x4d2   : > { %v4956_v27 = vpop.f32.mrf.mxu1 }
 0x4d3   : > { %v4233_v28 = vmax.f32 %v4228_v11, 0.0 }
 0x4d4   : > { %v4230_v29 = vpop.f32.mrf.mxu1 }
 0x4d5   : > { %4235 = vst.msk [vmem:[%s270_s29] sm:$0x1] %vm4234_vm14, %v4233_v28 }
 0x4d6   : > { %v4957_v31 = vpop.f32.mrf.mxu1 }
 0x4d7   : > { %5442 = shalt.err (!%p5439_p3)
}
 0x4d8   : > { %s5443_s19 = scalar_lea.hbm %s7059_s14, 16  ;;  %s5447_s22 = scalar_lea.hbm %s7107_s7, 32 }
 0x4d9   : > { %p5444_p4 = scmp.ne.s32.totalorder %s7059_s14, %s5443_s19  ;;  %p5448_p9 = scmp.lt.s32.totalorder %s7059_s14, %s7107_s7 }
 0x4da   : > { %p5449_p10 = scmp.lt.s32.totalorder %s5447_s22, %s5443_s19 }
 0x4db   : > { %p5445_p7 = pnand %p5444_p4, %p5620_p5 }
 0x4dc   : > { %p5450_p11 = por %p5449_p10, %p5448_p9 }
 0x4dd   : > { %p5446_p8 = pneg %p5445_p7 }
 0x4df   : > { %p5451_p12 = pnand %p5450_p11, %p5446_p8 }
 0x4e1   : > { %5454 = shalt.err (!%p5451_p12)
}
 0x4e2   : > { %4959 = dma.vmem_to_hbm [thread:$0]  (%p5620_p5), %s7061_s8, 16, %s7059_s14, %s4237_s28  }
 0x4e3 PF: > { %p4965_p13 = scmp.ge.s32.totalorder %s5489_s27, 2  ;;  %s4261_s9 = sand.u32 1, %s5477_s24  }
 0x4e4   : > { %s4262_s13 = scalar_lea.sflag [#allocation5], %s4261_s9 }
 0x4e5   : > { %p4962_p0 = pnand %p4965_p13, %p5624_p6 }
 0x4e7   : > { %p4963_p1 = pneg %p4962_p0 }
 0x4e9   : > { %5472 = dma.done.wait (%p4963_p1), %s4262_s13, 16  }
 0x4ea   : > { %5474 = vsyncadd (%p4963_p1), %s4262_s13, 4294967280  ;;  %p17_p2 = scmp.ge.s32.totalorder %s5607_s30, 4   ;;  %s7230_s24 = smov %s5481_s25 }
 0x4eb   : > { %s7231_s25 = smov %s5485_s26  ;;  %s7232_s26 = smov %s5618_s10 }
 0x4ec   : > { %s7233_s27 = smov %s5607_s30  ;;  %19 = sbr.rel (!%p17_p2) target bundleno = 3 (0x3), region = 83 }
 0x4f1   :  { %4266 = vsyncpa [#allocation5], 1 }
 0x4f2   :  { %4268 = vsyncpa [#allocation5 + $0x1], 1 }

</bundles_post_ra>
